<compile_context>
chip_gen: v7x
topology: tpu7x:2x2x1
jax: 0.10.0
libtpu: 0.0.40
codegen_flags: <defaults>
</compile_context>

<pallas_src>
from functools import partial

import jax
import jax.numpy as jnp
from jax.experimental import pallas as pl
from jax.experimental.pallas import tpu as pltpu

FEAT_DIM = 1024   # CLIP RN50 image-embedding dim
BIT = 128         # hash-bit output dim (nn.Linear(1024, bit))
PATCH = 4         # patch size for the backbone stand-in
M_CAP = 2048      # max rows (TB*tp) per grid step -> feats f32 intermediate <= 8 MiB


def _largest_tile(n, cap, step):
    """Largest multiple-of-`step` divisor of n that is <= cap (None if none)."""
    best = None
    t = step
    lim = min(cap, n)
    while t <= lim:
        if n % t == 0:
            best = t
        t += step
    return best


def _choose_tb(b, cap=8):
    """Largest divisor of b that is <= cap (>= 1)."""
    for d in range(min(b, cap), 0, -1):
        if b % d == 0:
            return d
    return 1


# ---------------------------------------------------------------------------
# Parameters
# ---------------------------------------------------------------------------
def init_params(key, in_channels=3, bit=BIT):
    k1, k2, k3, k4 = jax.random.split(key, 4)
    kdim = in_channels * PATCH * PATCH
    # backbone stand-in (patch embedding)
    wp = jax.random.normal(k1, (kdim, FEAT_DIM), jnp.float32) * 0.02
    bp = jax.random.normal(k2, (1, FEAT_DIM), jnp.float32) * 0.02
    # nn.Linear(1024, bit): PyTorch stores weight as [bit, 1024]; keep the
    # transposed [1024, bit] layout for the x @ W^T matmul.
    wl = jax.random.normal(k3, (FEAT_DIM, bit), jnp.float32) * 0.02
    bl = jax.random.normal(k4, (1, bit), jnp.float32) * 0.02
    return dict(wp=wp, bp=bp, wl=wl, bl=bl)


def prepare_params(params):
    """One-time weight prep (frozen model): cast the patch-embed weight to
    bf16 for the MXU so the per-call wrapper does no weight work."""
    return dict(
        wp=params["wp"].astype(jnp.bfloat16),   # [K, 1024] bf16 (MXU operand)
        bp=params["bp"].astype(jnp.float32),    # [1, 1024]
        wl=params["wl"].astype(jnp.float32),    # [1024, bit] (tiny epilogue matmul)
        bl=params["bl"].astype(jnp.float32),    # [1, bit]
    )


# ---------------------------------------------------------------------------
# Fused kernel: patch-embed + ReLU + mean-pool + Linear(1024, bit) + tanh
# ---------------------------------------------------------------------------
@partial(jax.jit, static_argnames=("tp",))
def clip_model_forward(params, x, *, tp=None):
    """x: [B, C, H, W] float32 (NCHW, like PyTorch). Returns [B, BIT] f32."""
    B, C, H, W = x.shape
    assert H % PATCH == 0 and W % PATCH == 0
    P = (H // PATCH) * (W // PATCH)
    K = C * PATCH * PATCH                      # contraction dim (NOT padded in HBM)

    # ---- glue: bf16 cast fused into the patchify transpose (under jit) ----
    patches = x.astype(jnp.bfloat16)
    patches = patches.reshape(B, C, H // PATCH, PATCH, W // PATCH, PATCH)
    patches = patches.transpose(0, 2, 4, 1, 3, 5).reshape(B, P, K)

    wp = params["wp"]                          # [K, F] bf16 (pre-cast, frozen)
    bp = params["bp"]
    wl = params["wl"]
    bl = params["bl"]
    bit = wl.shape[1]

    # ---- tiling: batch tile TB (<=8), patch tile tp (multiple of 16) ----
    TB = _choose_tb(B, cap=8)
    tp_cap = max(16, M_CAP // TB)
    if tp is None:
        tp = _largest_tile(P, tp_cap, 16)
        if tp is None:
            if P % 8 == 0:
                tp = P                         # full patch axis (legal: == array dim)
            else:
                raise ValueError(f"patch count P={P} must be a multiple of 8")
    assert P % tp == 0 and tp % 8 == 0, (P, tp)
    num_b = B // TB
    num_p = P // tp
    inv_p = 1.0 / float(P)                     # compile-time constant for the mean

    def fused_kernel(p_ref, wp_ref, bp_ref, wl_ref, bl_ref, o_ref, acc_ref):
        pj = pl.program_id(1)

        # init per-batch partial-sum accumulator at the first patch tile
        @pl.when(pj == 0)
        def _():
            acc_ref[...] = jnp.zeros_like(acc_ref)

        # patch embedding on the flattened (TB*tp, K) slab: bf16 MXU, f32 acc
        slab = p_ref[...].reshape(TB * tp, K)
        feats = jnp.dot(slab, wp_ref[...],
                        preferred_element_type=jnp.float32)       # [TB*tp, F]
        feats = jnp.maximum(feats + bp_ref[...], 0.0)             # bias + ReLU

        # per-batch [8, F] partial sums: pure same-lane VPU adds (no XLU here)
        acc_ref[...] += feats.reshape(TB, tp // 8, 8, FEAT_DIM).sum(axis=1)

        # epilogue on the last patch tile: 8->1 reduce, mean, Linear, tanh
        @pl.when(pj == num_p - 1)
        def _():
            mean_feat = acc_ref[...].sum(axis=1) * inv_p          # [TB, F]
            out = jnp.dot(mean_feat, wl_ref[...],
                          preferred_element_type=jnp.float32)     # [TB, bit]
            o_ref[...] = jnp.tanh(out + bl_ref[...])

    flops = 2 * B * P * K * FEAT_DIM + 2 * B * FEAT_DIM * bit
    bytes_accessed = (patches.size * 2 + wp.size * 2 + bp.size * 4
                      + wl.size * 4 + bl.size * 4 + B * bit * 4)

    return pl.pallas_call(
        fused_kernel,
        out_shape=jax.ShapeDtypeStruct((B, bit), jnp.float32),
        grid_spec=pltpu.PrefetchScalarGridSpec(
            num_scalar_prefetch=0,
            grid=(num_b, num_p),                                   # (batch tiles, patch tiles)
            in_specs=[
                pl.BlockSpec((TB, tp, K), lambda b, p: (b, p, 0)),      # patches tile
                pl.BlockSpec((K, FEAT_DIM), lambda b, p: (0, 0)),       # wp (resident)
                pl.BlockSpec((1, FEAT_DIM), lambda b, p: (0, 0)),       # bp
                pl.BlockSpec((FEAT_DIM, bit), lambda b, p: (0, 0)),     # wl
                pl.BlockSpec((1, bit), lambda b, p: (0, 0)),            # bl
            ],
            out_specs=pl.BlockSpec((TB, bit), lambda b, p: (b, 0)),
            scratch_shapes=[pltpu.VMEM((TB, 8, FEAT_DIM), jnp.float32)],  # partial sums
        ),
        compiler_params=pltpu.CompilerParams(
            # batch axis -> megacore parallel; patch axis is the reduction
            dimension_semantics=("parallel", "arbitrary"),
            vmem_limit_bytes=32 * 1024 * 1024,
        ),
        cost_estimate=pl.CostEstimate(
            flops=flops, transcendentals=B * bit, bytes_accessed=bytes_accessed),
    )(patches, wp, bp, wl, bl)


# ---------------------------------------------------------------------------
# Pure-JAX reference (f32) for correctness checking
# ---------------------------------------------------------------------------
def clip_model_reference(params, x):
    B, C, H, W = x.shape
    P = (H // PATCH) * (W // PATCH)
    patches = x.reshape(B, C, H // PATCH, PATCH, W // PATCH, PATCH)
    patches = patches.transpose(0, 2, 4, 1, 3, 5).reshape(B, P, C * PATCH * PATCH)
    feats = jnp.maximum(patches @ params["wp"] + params["bp"], 0.0)
    feat = feats.mean(axis=1)
    return jnp.tanh(feat @ params["wl"] + params["bl"])


if __name__ == "__main__":
    key = jax.random.PRNGKey(0)
    kx, kp = jax.random.split(key)
    # small shapes consistent with an image model: batch=2, RGB, 32x32 -> 64 patches
    x = jax.random.normal(kx, (2, 3, 32, 32), jnp.float32)
    params = init_params(kp, in_channels=3, bit=BIT)
    prep = prepare_params(params)                 # one-time weight prep (frozen model)

    out = jax.block_until_ready(clip_model_forward(prep, x))            # tp auto (=64)
    out_tiled = jax.block_until_ready(clip_model_forward(prep, x, tp=16))  # 4 reduction steps
    ref = jax.block_until_ready(clip_model_reference(params, x))

    assert out.shape == (2, BIT), out.shape
    assert bool(jnp.all(jnp.isfinite(out)))
    assert bool(jnp.all(jnp.abs(out) <= 1.0))                           # tanh range
    # bf16 matmul inputs introduce ~1e-2 relative error vs the f32 reference
    assert bool(jnp.allclose(out, ref, atol=5e-2, rtol=5e-2))
    assert bool(jnp.allclose(out_tiled, ref, atol=5e-2, rtol=5e-2))
    print("KERNEL_OK")
</pallas_src>

<mosaic_0001>
module attributes {stable_mosaic.version = 11 : i64} {
  func.func @fused_kernel(%arg0: i32, %arg1: i32, %arg2: memref<2x64x48xbf16, #tpu.memory_space<vmem>>, %arg3: memref<48x1024xbf16, #tpu.memory_space<vmem>>, %arg4: memref<1x1024xf32, #tpu.memory_space<vmem>>, %arg5: memref<1024x128xf32, #tpu.memory_space<vmem>>, %arg6: memref<1x128xf32, #tpu.memory_space<vmem>>, %arg7: memref<2x128xf32, #tpu.memory_space<vmem>>, %arg8: memref<2x8x1024xf32, #tpu.memory_space<vmem>>) attributes {dimension_semantics = [#tpu.dimension_semantics<parallel>, #tpu.dimension_semantics<arbitrary>], iteration_bounds = array<i64: 1, 1>, scalar_prefetch = 0 : i64, scratch_operands = 1 : i64, tpu.core_type = #tpu.core_type<tc>, window_params = [{transform_indices = @transform_0, window_bounds = array<i64: 2, 64, 48>}, {pipeline_mode = #tpu.pipeline_mode<synchronous>, transform_indices = @transform_1, window_bounds = array<i64: 48, 1024>}, {pipeline_mode = #tpu.pipeline_mode<synchronous>, transform_indices = @transform_2, window_bounds = array<i64: 1, 1024>}, {pipeline_mode = #tpu.pipeline_mode<synchronous>, transform_indices = @transform_3, window_bounds = array<i64: 1024, 128>}, {pipeline_mode = #tpu.pipeline_mode<synchronous>, transform_indices = @transform_4, window_bounds = array<i64: 1, 128>}, {transform_indices = @transform_5, window_bounds = array<i64: 2, 128>}]} {
    %c0_i32 = arith.constant 0 : i32
    %0 = arith.cmpi eq, %arg1, %c0_i32 : i32
    %1 = arith.extui %0 : i1 to i32
    %c0_i32_0 = arith.constant 0 : i32
    %2 = arith.cmpi ne, %1, %c0_i32_0 : i32
    scf.if %2 {
      %cst_17 = arith.constant 0.000000e+00 : f32
      %20 = vector.broadcast %cst_17 : f32 to vector<2x8x1024xf32>
      %c0_18 = arith.constant 0 : index
      %c0_19 = arith.constant 0 : index
      %c0_20 = arith.constant 0 : index
      %21 = vector.load %arg8[%c0_18, %c0_19, %c0_20] : memref<2x8x1024xf32, #tpu.memory_space<vmem>>, vector<2x8x1024xf32>
      tpu.vector_store %arg8[%c0_18, %c0_19, %c0_20], %20 {strides = array<i32>} : memref<2x8x1024xf32, #tpu.memory_space<vmem>>, vector<2x8x1024xf32>,
    } else {
    }
    %c0 = arith.constant 0 : index
    %c0_1 = arith.constant 0 : index
    %c0_2 = arith.constant 0 : index
    %3 = vector.load %arg2[%c0, %c0_1, %c0_2] : memref<2x64x48xbf16, #tpu.memory_space<vmem>>, vector<2x64x48xbf16>
    %4 = vector.shape_cast %3 : vector<2x64x48xbf16> to vector<128x48xbf16>
    %c0_3 = arith.constant 0 : index
    %c0_4 = arith.constant 0 : index
    %5 = vector.load %arg3[%c0_3, %c0_4] : memref<48x1024xbf16, #tpu.memory_space<vmem>>, vector<48x1024xbf16>
    %cst = arith.constant dense<0.000000e+00> : vector<128x1024xf32>
    %6 = tpu.matmul %4, %5, %cst {dimension_numbers = #tpu.dot_dimension_numbers<[1], [0], [0], [1], [0, 0, 1, 1], [], []>} : vector<128x48xbf16>, vector<48x1024xbf16>, vector<128x1024xf32> -> vector<128x1024xf32>
    %c0_5 = arith.constant 0 : index
    %c0_6 = arith.constant 0 : index
    %7 = vector.load %arg4[%c0_5, %c0_6] : memref<1x1024xf32, #tpu.memory_space<vmem>>, vector<1x1024xf32>
    %8 = vector.broadcast %7 : vector<1x1024xf32> to vector<128x1024xf32>
    %9 = arith.addf %6, %8 : vector<128x1024xf32>
    %cst_7 = arith.constant 0.000000e+00 : f32
    %10 = vector.broadcast %cst_7 : f32 to vector<128x1024xf32>
    %11 = arith.maximumf %9, %10 : vector<128x1024xf32>
    %c0_8 = arith.constant 0 : index
    %c0_9 = arith.constant 0 : index
    %c0_10 = arith.constant 0 : index
    %12 = vector.load %arg8[%c0_8, %c0_9, %c0_10] : memref<2x8x1024xf32, #tpu.memory_space<vmem>>, vector<2x8x1024xf32>
    %13 = vector.shape_cast %11 : vector<128x1024xf32> to vector<2x8x8x1024xf32>
    %cst_11 = arith.constant dense<0.000000e+00> : vector<2x8x1024xf32>
    %14 = vector.multi_reduction <add>, %13, %cst_11 [1] : vector<2x8x8x1024xf32> to vector<2x8x1024xf32>
    %15 = arith.addf %12, %14 : vector<2x8x1024xf32>
    %c0_12 = arith.constant 0 : index
    %c0_13 = arith.constant 0 : index
    %c0_14 = arith.constant 0 : index
    %16 = vector.load %arg8[%c0_12, %c0_13, %c0_14] : memref<2x8x1024xf32, #tpu.memory_space<vmem>>, vector<2x8x1024xf32>
    tpu.vector_store %arg8[%c0_12, %c0_13, %c0_14], %15 {strides = array<i32>} : memref<2x8x1024xf32, #tpu.memory_space<vmem>>, vector<2x8x1024xf32>,
    %c0_i32_15 = arith.constant 0 : i32
    %17 = arith.cmpi eq, %arg1, %c0_i32_15 : i32
    %18 = arith.extui %17 : i1 to i32
    %c0_i32_16 = arith.constant 0 : i32
    %19 = arith.cmpi ne, %18, %c0_i32_16 : i32
    scf.if %19 {
      %c0_17 = arith.constant 0 : index
      %c0_18 = arith.constant 0 : index
      %c0_19 = arith.constant 0 : index
      %20 = vector.load %arg8[%c0_17, %c0_18, %c0_19] : memref<2x8x1024xf32, #tpu.memory_space<vmem>>, vector<2x8x1024xf32>
      %cst_20 = arith.constant dense<0.000000e+00> : vector<2x1024xf32>
      %21 = vector.multi_reduction <add>, %20, %cst_20 [1] : vector<2x8x1024xf32> to vector<2x1024xf32>
      %cst_21 = arith.constant 1.562500e-02 : f32
      %22 = vector.broadcast %cst_21 : f32 to vector<2x1024xf32>
      %23 = arith.mulf %21, %22 : vector<2x1024xf32>
      %c0_22 = arith.constant 0 : index
      %c0_23 = arith.constant 0 : index
      %24 = vector.load %arg5[%c0_22, %c0_23] : memref<1024x128xf32, #tpu.memory_space<vmem>>, vector<1024x128xf32>
      %cst_24 = arith.constant dense<0.000000e+00> : vector<2x128xf32>
      %25 = tpu.matmul %23, %24, %cst_24 {dimension_numbers = #tpu.dot_dimension_numbers<[1], [0], [0], [1], [0, 0, 1, 1], [], []>} : vector<2x1024xf32>, vector<1024x128xf32>, vector<2x128xf32> -> vector<2x128xf32>
      %c0_25 = arith.constant 0 : index
      %c0_26 = arith.constant 0 : index
      %26 = vector.load %arg6[%c0_25, %c0_26] : memref<1x128xf32, #tpu.memory_space<vmem>>, vector<1x128xf32>
      %27 = vector.broadcast %26 : vector<1x128xf32> to vector<2x128xf32>
      %28 = arith.addf %25, %27 : vector<2x128xf32>
      %29 = math.tanh %28 : vector<2x128xf32>
      %c0_27 = arith.constant 0 : index
      %c0_28 = arith.constant 0 : index
      %30 = vector.load %arg7[%c0_27, %c0_28] : memref<2x128xf32, #tpu.memory_space<vmem>>, vector<2x128xf32>
      tpu.vector_store %arg7[%c0_27, %c0_28], %29 {strides = array<i32>} : memref<2x128xf32, #tpu.memory_space<vmem>>, vector<2x128xf32>,
    } else {
    }
    return
  }
  func.func @transform_0(%arg0: i32, %arg1: i32) -> (i32, i32, i32) {
    %c0_i32 = arith.constant 0 : i32
    %c0_i32_0 = arith.constant 0 : i32
    return %arg0, %arg1, %c0_i32 : i32, i32, i32
  }
  func.func @transform_1(%arg0: i32, %arg1: i32) -> (i32, i32) {
    %c0_i32 = arith.constant 0 : i32
    %c0_i32_0 = arith.constant 0 : i32
    %c0_i32_1 = arith.constant 0 : i32
    return %c0_i32, %c0_i32_0 : i32, i32
  }
  func.func @transform_2(%arg0: i32, %arg1: i32) -> (i32, i32) {
    %c0_i32 = arith.constant 0 : i32
    %c0_i32_0 = arith.constant 0 : i32
    %c0_i32_1 = arith.constant 0 : i32
    return %c0_i32, %c0_i32_0 : i32, i32
  }
  func.func @transform_3(%arg0: i32, %arg1: i32) -> (i32, i32) {
    %c0_i32 = arith.constant 0 : i32
    %c0_i32_0 = arith.constant 0 : i32
    %c0_i32_1 = arith.constant 0 : i32
    return %c0_i32, %c0_i32_0 : i32, i32
  }
  func.func @transform_4(%arg0: i32, %arg1: i32) -> (i32, i32) {
    %c0_i32 = arith.constant 0 : i32
    %c0_i32_0 = arith.constant 0 : i32
    %c0_i32_1 = arith.constant 0 : i32
    return %c0_i32, %c0_i32_0 : i32, i32
  }
  func.func @transform_5(%arg0: i32, %arg1: i32) -> (i32, i32) {
    %c0_i32 = arith.constant 0 : i32
    %c0_i32_0 = arith.constant 0 : i32
    return %arg0, %c0_i32 : i32, i32
  }
}

</mosaic_0001>

<bundles_post_ra>
// kernel: clip_model_forward.1
= control target key start
LH: loop header
LB: loop body
LE: loop exit
PB: predicated region body
PF: predicated region fallthrough
CT: control target
= control target key end

     0   :  { %v2013_v8 = vmov 0   ;;  %vm284_vm0 = vcmask 392192   ;;  %s3083_s0 = inlined_call_operand.vmem [shape: bf16[2,64,48], index: 0, kind: input, shape index: {}]   ;;  %s3084_s1 = inlined_call_operand.vmem [shape: bf16[48,1024], index: 1, kind: input, shape index: {}]   ;;  %s3085_s2 = inlined_call_operand.vmem [shape: f32[1,1024], index: 2, kind: input, shape index: {}]   ;;  %s3086_s3 = inlined_call_operand.vmem [shape: f32[1024,128], index: 3, kind: input, shape index: {}]   ;;  %s3087_s4 = inlined_call_operand.vmem [shape: f32[1,128], index: 4, kind: input, shape index: {}]   ;;  %s3088_s5 = inlined_call_operand.hbm [shape: f32[2,128], index: 5, kind: output, shape index: {}]  }
   0x1   :  { %v58_v0 = vld [vmem:[%s3084_s1] sm:$0xff]  ;;  %v59_v2 = vld [vmem:[%s3084_s1 + $0x8] sm:$0xff]  ;;  %341 = vmatprep.mubr.bf16.mxu0 %v2013_v8  ;;  %454 = vmatprep.mubr.bf16.mxu1 %v2013_v8  ;;  %v60_v22 = vld [vmem:[%s3084_s1 + $0x10] sm:$0xff] }
   0x2   :  { %v62_v1 = vld [vmem:[%s3084_s1 + $0x20] sm:$0xff]  ;;  %v63_v4 = vld [vmem:[%s3084_s1 + $0x28] sm:$0xff]  ;;  %v64_v23 = vld [vmem:[%s3084_s1 + $0x30] sm:$0xff] }
   0x3   :  { %v1653_v3 = vcombine.high %v58_v0, %v62_v1  ;;  %v1652_v5 = vcombine.low %v58_v0, %v62_v1  ;;  %v66_v6 = vld [vmem:[%s3084_s1 + $0x40] sm:$0xff]  ;;  %v1655_v9 = vcombine.high %v59_v2, %v63_v4  ;;  %v1654_v10 = vcombine.low %v59_v2, %v63_v4  ;;  %v67_v12 = vld [vmem:[%s3084_s1 + $0x48] sm:$0xff]  ;;  %v61_v25 = vld [vmem:[%s3084_s1 + $0x18] sm:$0xff] }
   0x4   :  { %v70_v7 = vld [vmem:[%s3084_s1 + $0x60] sm:$0xff]  ;;  %v71_v13 = vld [vmem:[%s3084_s1 + $0x68] sm:$0xff]  ;;  %v65_v26 = vld [vmem:[%s3084_s1 + $0x38] sm:$0xff]  ;;  %v1657_v29 = vcombine.high %v60_v22, %v64_v23  ;;  %v1656_v34 = vcombine.low %v60_v22, %v64_v23 }
   0x5   :  { %v1661_v11 = vcombine.high %v66_v6, %v70_v7  ;;  %v74_v14 = vld [vmem:[%s3084_s1 + $0x80] sm:$0xff]  ;;  %309 = vmatprep.subr.bf16.mxu0 %v1653_v3  ;;  %v1663_v15 = vcombine.high %v67_v12, %v71_v13  ;;  %v75_v17 = vld [vmem:[%s3084_s1 + $0x88] sm:$0xff]  ;;  %422 = vmatprep.subr.bf16.mxu1 %v1655_v9  ;;  %v1660_v19 = vcombine.low %v66_v6, %v70_v7  ;;  %v68_v32 = vld [vmem:[%s3084_s1 + $0x50] sm:$0xff] }
   0x6   :  { %v78_v16 = vld [vmem:[%s3084_s1 + $0xa0] sm:$0xff]  ;;  %v79_v18 = vld [vmem:[%s3084_s1 + $0xa8] sm:$0xff]  ;;  %310 = vmatpush1.bf16.msra.mxu0 %v1652_v5  ;;  %423 = vmatpush1.bf16.msra.mxu1 %v1654_v10  ;;  %v1662_v20 = vcombine.low %v67_v12, %v71_v13  ;;  %v1659_v31 = vcombine.high %v61_v25, %v65_v26  ;;  %v72_v33 = vld [vmem:[%s3084_s1 + $0x70] sm:$0xff]  ;;  %v1658_v37 = vcombine.low %v61_v25, %v65_v26 }
   0x7   :  { %311 = vmatprep.subr.bf16.mxu0 %v1661_v11  ;;  %v1669_v21 = vcombine.high %v74_v14, %v78_v16  ;;  %424 = vmatprep.subr.bf16.mxu1 %v1663_v15  ;;  %v1671_v24 = vcombine.high %v75_v17, %v79_v18  ;;  %v1668_v27 = vcombine.low %v74_v14, %v78_v16  ;;  %v2098_v30 = vld [vmem:[%s3083_s0] sm:$0xff]   ;;  %v69_v35 = vld [vmem:[%s3084_s1 + $0x58] sm:$0xff]  ;;  %v76_v38 = vld [vmem:[%s3084_s1 + $0x90] sm:$0xff] }
   0x8   :  { %v1670_v28 = vcombine.low %v75_v17, %v79_v18  ;;  %v73_v36 = vld [vmem:[%s3084_s1 + $0x78] sm:$0xff]  ;;  %v80_v39 = vld [vmem:[%s3084_s1 + $0xb0] sm:$0xff]  ;;  %v1665_v40 = vcombine.high %v68_v32, %v72_v33  ;;  %v1664_v44 = vcombine.low %v68_v32, %v72_v33 }
   0x9   :  { %v77_v41 = vld [vmem:[%s3084_s1 + $0x98] sm:$0xff]  ;;  %v1667_v42 = vcombine.high %v69_v35, %v73_v36 }
   0xa   :  { %312 = vmatpush1.bf16.msra.mxu0 %v1660_v19  ;;  %425 = vmatpush1.bf16.msra.mxu1 %v1662_v20  ;;  %v81_v43 = vld [vmem:[%s3084_s1 + $0xb8] sm:$0xff] }
   0xb   :  { %313 = vmatprep.subr.bf16.mxu0 %v1669_v21  ;;  %426 = vmatprep.subr.bf16.mxu1 %v1671_v24 }
   0xe   :  { %314 = vmatpush1.bf16.msra.mxu0 %v1668_v27  ;;  %427 = vmatpush1.bf16.msra.mxu1 %v1670_v28 }
   0xf   :  { %535 = vmatprep.subr.bf16.mxu0 %v1657_v29  ;;  %648 = vmatprep.subr.bf16.mxu1 %v1659_v31 }
  0x11   :  { %1676 = vmatmul.mubr.msk.bf16.vlgmr.msra.gmra.mrb[0].mxu0 %vm284_vm0, %v2098_v30  ;;  %1684 = vmatmul.mubr.msk.bf16.vlgmr.msra.gmra.mrb[0].mxu1 %vm284_vm0, %v2098_v30 }
  0x12   :  { %536 = vmatpush1.bf16.msra.mxu0 %v1656_v34 }
  0x13   :  { %10 = vsyncpa [#allocation4], 0  ;;  %649 = vmatpush1.bf16.msra.mxu1 %v1658_v37  ;;  %351 = vmatprep.mubr.bf16.mxu0 %v2013_v8  ;;  %v1666_v45 = vcombine.low %v69_v35, %v73_v36  ;;  %v1673_v46 = vcombine.high %v76_v38, %v80_v39  ;;  %v1675_v47 = vcombine.high %v77_v41, %v81_v43  ;;  %v1980_v48 = vld [vmem:[%s3083_s0 + $0x8] sm:$0xff]   ;;  %v1981_v51 = vld [vmem:[%s3083_s0 + $0x10] sm:$0xff]   ;;  %vm1331_vm1 = vcmask 1041409   ;;  %s2014_s16 = smov [#allocation3]  }
  0x14   :  { %464 = vmatprep.mubr.bf16.mxu1 %v2013_v8  ;;  %537 = vmatprep.subr.bf16.mxu0 %v1665_v40  ;;  %v1672_v49 = vcombine.low %v76_v38, %v80_v39  ;;  %v1674_v50 = vcombine.low %v77_v41, %v81_v43  ;;  %v1982_v52 = vld [vmem:[%s3083_s0 + $0x18] sm:$0xff]   ;;  %v1983_v53 = vld [vmem:[%s3083_s0 + $0x20] sm:$0xff]   ;;  %v1984_v54 = vld [vmem:[%s3083_s0 + $0x28] sm:$0xff]   ;;  %s1636_s17 = sshll.u32 %s2014_s16, 4  ;;  %s1637_s17 = int_to_ptr.vmem [resolvable:$true] %s1636_s17 }
  0x15   :  { %650 = vmatprep.subr.bf16.mxu1 %v1667_v42  ;;  %v1985_v55 = vld [vmem:[%s3083_s0 + $0x30] sm:$0xff]   ;;  %v1986_v56 = vld [vmem:[%s3083_s0 + $0x38] sm:$0xff]   ;;  %v1196_v57 = vld [vmem:[%s3086_s3 + $0x80] sm:$0xff]  ;;  %p1994_p1 = scmp.lt.s32.totalorder %s1637_s17, %s1637_s17 }
  0x16   :  { %538 = vmatpush1.bf16.msra.mxu0 %v1664_v44  ;;  %v1197_v58 = vld [vmem:[%s3086_s3 + $0x88] sm:$0xff]  ;;  %v1228_v59 = vld [vmem:[%s3086_s3 + $0x180] sm:$0xff]  ;;  %v1198_v5 = vld [vmem:[%s3086_s3 + $0x90] sm:$0xff] }
  0x17   :  { %651 = vmatpush1.bf16.msra.mxu1 %v1666_v45  ;;  %539 = vmatprep.subr.bf16.mxu0 %v1673_v46  ;;  %v1849_v60 = vpack.c.bf16 %v1197_v58, %v1196_v57  ;;  %v1229_v61 = vld [vmem:[%s3086_s3 + $0x188] sm:$0xff]  ;;  %v1180_v62 = vld [vmem:[%s3086_s3] sm:$0xff]  ;;  %v1199_v6 = vld [vmem:[%s3086_s3 + $0x98] sm:$0xff] }
  0x18   :  { %652 = vmatprep.subr.bf16.mxu1 %v1675_v47  ;;  %v1181_v63 = vld [vmem:[%s3086_s3 + $0x8] sm:$0xff]  ;;  %v1881_v0 = vpack.c.bf16 %v1229_v61, %v1228_v59  ;;  %v1212_v2 = vld [vmem:[%s3086_s3 + $0x100] sm:$0xff]  ;;  %v1230_v7 = vld [vmem:[%s3086_s3 + $0x190] sm:$0xff] }
  0x19   :  { %1677 = vmatmul.mubr.msk.bf16.gmra.mrb[4].mxu0 %vm284_vm0, %v1980_v48  ;;  %1685 = vmatmul.mubr.msk.bf16.gmra.mrb[4].mxu1 %vm284_vm0, %v1980_v48  ;;  %v1851_v1 = vpack.c.bf16 %v1181_v63, %v1180_v62  ;;  %v1213_v3 = vld [vmem:[%s3086_s3 + $0x108] sm:$0xff]  ;;  %v1231_v9 = vld [vmem:[%s3086_s3 + $0x198] sm:$0xff]  ;;  %v1182_v10 = vld [vmem:[%s3086_s3 + $0x10] sm:$0xff] }
  0x1a   :  { %361 = vmatprep.mubr.bf16.mxu0 %v2013_v8  ;;  %474 = vmatprep.mubr.bf16.mxu1 %v2013_v8  ;;  %v1883_v4 = vpack.c.bf16 %v1213_v3, %v1212_v2  ;;  %v1183_v11 = vld [vmem:[%s3086_s3 + $0x18] sm:$0xff]  ;;  %v1885_v12 = vpack.c.bf16 %v1231_v9, %v1230_v7  ;;  %v1214_v14 = vld [vmem:[%s3086_s3 + $0x110] sm:$0xff]  ;;  %v1200_v17 = vld [vmem:[%s3086_s3 + $0xa0] sm:$0xff] }
  0x1b   :  { %540 = vmatpush1.bf16.msra.mxu0 %v1672_v49  ;;  %653 = vmatpush1.bf16.msra.mxu1 %v1674_v50  ;;  %v1855_v13 = vpack.c.bf16 %v1183_v11, %v1182_v10  ;;  %v1215_v15 = vld [vmem:[%s3086_s3 + $0x118] sm:$0xff]  ;;  %v1201_v18 = vld [vmem:[%s3086_s3 + $0xa8] sm:$0xff]  ;;  %v1232_v19 = vld [vmem:[%s3086_s3 + $0x1a0] sm:$0xff] }
  0x1c   :  { %1850 = vmatprep.subr.bf16.mxu0 %v1849_v60  ;;  %1882 = vmatprep.subr.bf16.mxu1 %v1881_v0  ;;  %v1887_v16 = vpack.c.bf16 %v1215_v15, %v1214_v14  ;;  %v1857_v20 = vpack.c.bf16 %v1201_v18, %v1200_v17  ;;  %v1233_v21 = vld [vmem:[%s3086_s3 + $0x1a8] sm:$0xff]  ;;  %v1184_v22 = vld [vmem:[%s3086_s3 + $0x20] sm:$0xff]  ;;  %v1202_v29 = vld [vmem:[%s3086_s3 + $0xb0] sm:$0xff] }
  0x1d   :  { %v1185_v23 = vld [vmem:[%s3086_s3 + $0x28] sm:$0xff]  ;;  %v1889_v24 = vpack.c.bf16 %v1233_v21, %v1232_v19  ;;  %v1216_v26 = vld [vmem:[%s3086_s3 + $0x120] sm:$0xff]  ;;  %v1234_v31 = vld [vmem:[%s3086_s3 + $0x1b0] sm:$0xff] }
  0x1e   :  { %v1859_v25 = vpack.c.bf16 %v1185_v23, %v1184_v22  ;;  %v1217_v27 = vld [vmem:[%s3086_s3 + $0x128] sm:$0xff]  ;;  %v1235_v33 = vld [vmem:[%s3086_s3 + $0x1b8] sm:$0xff]  ;;  %v1186_v34 = vld [vmem:[%s3086_s3 + $0x30] sm:$0xff] }
  0x1f   :  { %v1891_v28 = vpack.c.bf16 %v1217_v27, %v1216_v26  ;;  %v1187_v35 = vld [vmem:[%s3086_s3 + $0x38] sm:$0xff]  ;;  %v1893_v36 = vpack.c.bf16 %v1235_v33, %v1234_v31  ;;  %v1218_v38 = vld [vmem:[%s3086_s3 + $0x130] sm:$0xff]  ;;  %v1204_v41 = vld [vmem:[%s3086_s3 + $0xc0] sm:$0xff] }
  0x20   :  { %v1863_v37 = vpack.c.bf16 %v1187_v35, %v1186_v34  ;;  %v1219_v39 = vld [vmem:[%s3086_s3 + $0x138] sm:$0xff]  ;;  %v1205_v42 = vld [vmem:[%s3086_s3 + $0xc8] sm:$0xff]  ;;  %v1236_v43 = vld [vmem:[%s3086_s3 + $0x1c0] sm:$0xff] }
  0x21   :  { %1678 = vmatmul.mubr.msk.bf16.gmra.mrb[8].mxu0 %vm284_vm0, %v1981_v51  ;;  %1686 = vmatmul.mubr.msk.bf16.gmra.mrb[8].mxu1 %vm284_vm0, %v1981_v51  ;;  %v1895_v40 = vpack.c.bf16 %v1219_v39, %v1218_v38  ;;  %v1865_v44 = vpack.c.bf16 %v1205_v42, %v1204_v41  ;;  %v1237_v45 = vld [vmem:[%s3086_s3 + $0x1c8] sm:$0xff]  ;;  %v1188_v46 = vld [vmem:[%s3086_s3 + $0x40] sm:$0xff]  ;;  %v1239_v57 = vld [vmem:[%s3086_s3 + $0x1d8] sm:$0xff] }
  0x22   :  { %371 = vmatprep.mubr.bf16.mxu0 %v2013_v8  ;;  %484 = vmatprep.mubr.bf16.mxu1 %v2013_v8  ;;  %v1189_v47 = vld [vmem:[%s3086_s3 + $0x48] sm:$0xff]  ;;  %v1220_v50 = vld [vmem:[%s3086_s3 + $0x140] sm:$0xff]  ;;  %v1190_v58 = vld [vmem:[%s3086_s3 + $0x50] sm:$0xff] }
  0x23   :  { %v1867_v49 = vpack.c.bf16 %v1189_v47, %v1188_v46  ;;  %v1191_v59 = vld [vmem:[%s3086_s3 + $0x58] sm:$0xff]  ;;  %v1222_v62 = vld [vmem:[%s3086_s3 + $0x150] sm:$0xff]  ;;  %v1209_v2 = vld [vmem:[%s3086_s3 + $0xe8] sm:$0xff] }
  0x24   :  { %v1871_v61 = vpack.c.bf16 %v1191_v59, %v1190_v58  ;;  %v1223_v63 = vld [vmem:[%s3086_s3 + $0x158] sm:$0xff]  ;;  %v1240_v3 = vld [vmem:[%s3086_s3 + $0x1e0] sm:$0xff]  ;;  %v1193_v7 = vld [vmem:[%s3086_s3 + $0x68] sm:$0xff] }
  0x25   :  { %v1903_v0 = vpack.c.bf16 %v1223_v63, %v1222_v62  ;;  %v1224_v10 = vld [vmem:[%s3086_s3 + $0x160] sm:$0xff]  ;;  %v1225_v11 = vld [vmem:[%s3086_s3 + $0x168] sm:$0xff]  ;;  %v1211_v14 = vld [vmem:[%s3086_s3 + $0xf8] sm:$0xff] }
  0x26   :  { %v1242_v15 = vld [vmem:[%s3086_s3 + $0x1f0] sm:$0xff]  ;;  %v1243_v17 = vld [vmem:[%s3086_s3 + $0x1f8] sm:$0xff]  ;;  %v1260_v27 = vld [vmem:[%s3086_s3 + $0x280] sm:$0xff] }
  0x27   :  { %v1194_v18 = vld [vmem:[%s3086_s3 + $0x70] sm:$0xff]  ;;  %v1195_v19 = vld [vmem:[%s3086_s3 + $0x78] sm:$0xff]  ;;  %v2421_v33 = vld [vmem:[%s3085_s2] sm:$0xff] }
  0x28   :  { %v1879_v21 = vpack.c.bf16 %v1195_v19, %v1194_v18  ;;  %v1226_v22 = vld [vmem:[%s3086_s3 + $0x170] sm:$0xff]  ;;  %v1227_v23 = vld [vmem:[%s3086_s3 + $0x178] sm:$0xff] }
  0x29   :  { %1679 = vmatmul.mubr.msk.bf16.gmra.mrb[12].mxu0 %vm284_vm0, %v1982_v52  ;;  %1687 = vmatmul.mubr.msk.bf16.gmra.mrb[12].mxu1 %vm284_vm0, %v1982_v52 }
  0x2a   :  { %381 = vmatprep.mubr.bf16.mxu0 %v2013_v8  ;;  %494 = vmatprep.mubr.bf16.mxu1 %v2013_v8 }
  0x31   :  { %1680 = vmatmul.mubr.msk.bf16.gmra.mrb[16].mxu0 %vm284_vm0, %v1983_v53  ;;  %1688 = vmatmul.mubr.msk.bf16.gmra.mrb[16].mxu1 %vm284_vm0, %v1983_v53 }
  0x32   :  { %391 = vmatprep.mubr.bf16.mxu0 %v2013_v8  ;;  %504 = vmatprep.mubr.bf16.mxu1 %v2013_v8 }
  0x39   :  { %1681 = vmatmul.mubr.msk.bf16.gmra.mrb[20].mxu0 %vm284_vm0, %v1984_v54  ;;  %1689 = vmatmul.mubr.msk.bf16.gmra.mrb[20].mxu1 %vm284_vm0, %v1984_v54 }
  0x3a   :  { %401 = vmatprep.mubr.bf16.mxu0 %v2013_v8  ;;  %514 = vmatprep.mubr.bf16.mxu1 %v2013_v8 }
  0x41   :  { %1682 = vmatmul.mubr.msk.bf16.gmra.mrb[24].mxu0 %vm284_vm0, %v1985_v55  ;;  %1690 = vmatmul.mubr.msk.bf16.gmra.mrb[24].mxu1 %vm284_vm0, %v1985_v55 }
  0x42   :  { %411 = vmatprep.mubr.bf16.mxu0 %v2013_v8  ;;  %524 = vmatprep.mubr.bf16.mxu1 %v2013_v8 }
  0x49   :  { %1683 = vmatmul.mubr.msk.bf16.gmra.mrb[28].mxu0 %vm284_vm0, %v1986_v56  ;;  %1691 = vmatmul.mubr.msk.bf16.gmra.mrb[28].mxu1 %vm284_vm0, %v1986_v56 }
  0x4a   :  { %567 = vmatprep.mubr.bf16.mxu0 %v2013_v8  ;;  %680 = vmatprep.mubr.bf16.mxu1 %v2013_v8 }
  0x51   :  { %1692 = vmatmul.mubr.msk.bf16.vlgmr.msra.gmra.mrb[32].mxu0 %vm284_vm0, %v2098_v30  ;;  %1700 = vmatmul.mubr.msk.bf16.vlgmr.msra.gmra.mrb[32].mxu1 %vm284_vm0, %v2098_v30  ;;  %v1203_v30 = vld [vmem:[%s3086_s3 + $0xb8] sm:$0xff] }
  0x52   :  { %577 = vmatprep.mubr.bf16.mxu0 %v2013_v8  ;;  %690 = vmatprep.mubr.bf16.mxu1 %v2013_v8  ;;  %v1861_v32 = vpack.c.bf16 %v1203_v30, %v1202_v29  ;;  %v1292_v29 = vld [vmem:[%s3086_s3 + $0x380] sm:$0xff] }
  0x53   :  { %1852 = vmatpush3.bf16.msra.mxu0 %v1851_v1  ;;  %1884 = vmatpush3.bf16.msra.mxu1 %v1883_v4  ;;  %v1208_v1 = vld [vmem:[%s3086_s3 + $0xe0] sm:$0xff] }
  0x54   :  { %1886 = vmatprep.subr.bf16.mxu1 %v1885_v12  ;;  %v1873_v4 = vpack.c.bf16 %v1209_v2, %v1208_v1  ;;  %v1907_v12 = vpack.c.bf16 %v1225_v11, %v1224_v10 }
  0x57   :  { %1888 = vmatpush3.bf16.msra.mxu1 %v1887_v16 }
  0x58   :  { %1890 = vmatprep.subr.bf16.mxu1 %v1889_v24  ;;  %v1911_v24 = vpack.c.bf16 %v1227_v23, %v1226_v22 }
  0x59   :  { %1693 = vmatmul.mubr.msk.bf16.gmra.mrb[36].mxu0 %vm284_vm0, %v1980_v48  ;;  %1701 = vmatmul.mubr.msk.bf16.gmra.mrb[36].mxu1 %vm284_vm0, %v1980_v48  ;;  %v1897_v48 = vpack.c.bf16 %v1237_v45, %v1236_v43 }
  0x5a   :  { %587 = vmatprep.mubr.bf16.mxu0 %v2013_v8  ;;  %700 = vmatprep.mubr.bf16.mxu1 %v2013_v8 }
  0x5b   :  { %1892 = vmatpush3.bf16.msra.mxu1 %v1891_v28  ;;  %v1261_v28 = vld [vmem:[%s3086_s3 + $0x288] sm:$0xff] }
  0x5c   :  { %1894 = vmatprep.subr.bf16.mxu1 %v1893_v36  ;;  %v1913_v31 = vpack.c.bf16 %v1261_v28, %v1260_v27 }
  0x5f   :  { %1896 = vmatpush3.bf16.msra.mxu1 %v1895_v40 }
  0x60   :  { %1898 = vmatprep.subr.bf16.mxu1 %v1897_v48 }
  0x61   :  { %1694 = vmatmul.mubr.msk.bf16.gmra.mrb[40].mxu0 %vm284_vm0, %v1981_v51  ;;  %1702 = vmatmul.mubr.msk.bf16.gmra.mrb[40].mxu1 %vm284_vm0, %v1981_v51  ;;  %v1221_v51 = vld [vmem:[%s3086_s3 + $0x148] sm:$0xff] }
  0x62   :  { %597 = vmatprep.mubr.bf16.mxu0 %v2013_v8  ;;  %710 = vmatprep.mubr.bf16.mxu1 %v2013_v8 }
  0x69   :  { %1695 = vmatmul.mubr.msk.bf16.gmra.mrb[44].mxu0 %vm284_vm0, %v1982_v52  ;;  %1703 = vmatmul.mubr.msk.bf16.gmra.mrb[44].mxu1 %vm284_vm0, %v1982_v52  ;;  %v1899_v52 = vpack.c.bf16 %v1221_v51, %v1220_v50 }
  0x6a   :  { %607 = vmatprep.mubr.bf16.mxu0 %v2013_v8  ;;  %720 = vmatprep.mubr.bf16.mxu1 %v2013_v8 }
  0x6b   :  { %1900 = vmatpush3.bf16.msra.mxu1 %v1899_v52 }
  0x71   :  { %1696 = vmatmul.mubr.msk.bf16.gmra.mrb[48].mxu0 %vm284_vm0, %v1983_v53  ;;  %1704 = vmatmul.mubr.msk.bf16.gmra.mrb[48].mxu1 %vm284_vm0, %v1983_v53  ;;  %v1206_v53 = vld [vmem:[%s3086_s3 + $0xd0] sm:$0xff] }
  0x72   :  { %617 = vmatprep.mubr.bf16.mxu0 %v2013_v8  ;;  %730 = vmatprep.mubr.bf16.mxu1 %v2013_v8 }
  0x79   :  { %1697 = vmatmul.mubr.msk.bf16.gmra.mrb[52].mxu0 %vm284_vm0, %v1984_v54  ;;  %1705 = vmatmul.mubr.msk.bf16.gmra.mrb[52].mxu1 %vm284_vm0, %v1984_v54  ;;  %v1207_v54 = vld [vmem:[%s3086_s3 + $0xd8] sm:$0xff] }
  0x7a   :  { %627 = vmatprep.mubr.bf16.mxu0 %v2013_v8  ;;  %740 = vmatprep.mubr.bf16.mxu1 %v2013_v8 }
  0x81   :  { %1698 = vmatmul.mubr.msk.bf16.gmra.mrb[56].mxu0 %vm284_vm0, %v1985_v55  ;;  %1706 = vmatmul.mubr.msk.bf16.gmra.mrb[56].mxu1 %vm284_vm0, %v1985_v55  ;;  %v1238_v55 = vld [vmem:[%s3086_s3 + $0x1d0] sm:$0xff] }
  0x82   :  { %637 = vmatprep.mubr.bf16.mxu0 %v2013_v8  ;;  %750 = vmatprep.mubr.bf16.mxu1 %v2013_v8  ;;  %v1853_v8 = vpack.c.bf16 %v1199_v6, %v1198_v5  ;;  %v1901_v60 = vpack.c.bf16 %v1239_v57, %v1238_v55  ;;  %v1241_v5 = vld [vmem:[%s3086_s3 + $0x1e8] sm:$0xff]  ;;  %v1192_v6 = vld [vmem:[%s3086_s3 + $0x60] sm:$0xff] }
  0x83   :  { %v1875_v9 = vpack.c.bf16 %v1193_v7, %v1192_v6 }
  0x84   :  { %1854 = vmatprep.subr.bf16.mxu0 %v1853_v8  ;;  %1902 = vmatprep.subr.bf16.mxu1 %v1901_v60  ;;  %v1905_v8 = vpack.c.bf16 %v1241_v5, %v1240_v3 }
  0x85   :  { %1856 = vmatpush3.bf16.msra.mxu0 %v1855_v13  ;;  %1904 = vmatpush3.bf16.msra.mxu1 %v1903_v0  ;;  %v1210_v13 = vld [vmem:[%s3086_s3 + $0xf0] sm:$0xff] }
  0x86   :  { %1858 = vmatprep.subr.bf16.mxu0 %v1857_v20  ;;  %1906 = vmatprep.subr.bf16.mxu1 %v1905_v8  ;;  %v1877_v16 = vpack.c.bf16 %v1211_v14, %v1210_v13  ;;  %v1909_v20 = vpack.c.bf16 %v1243_v17, %v1242_v15 }
  0x89   :  { %1699 = vmatmul.mubr.msk.bf16.gmra.mrb[60].mxu0 %vm284_vm0, %v1986_v56  ;;  %1707 = vmatmul.mubr.msk.bf16.gmra.mrb[60].mxu1 %vm284_vm0, %v1986_v56  ;;  %v1869_v56 = vpack.c.bf16 %v1207_v54, %v1206_v53 }
  0x8a   :  { %1860 = vmatpush3.bf16.msra.mxu0 %v1859_v25  ;;  %1908 = vmatpush3.bf16.msra.mxu1 %v1907_v12  ;;  %v84_v25 = vlaneseq }
  0x8b   :  { %1862 = vmatprep.subr.bf16.mxu0 %v1861_v32  ;;  %1910 = vmatprep.subr.bf16.mxu1 %v1909_v20  ;;  %v1293_v32 = vld [vmem:[%s3086_s3 + $0x388] sm:$0xff] }
  0x8c   :  { %v2403_v26 = vshrl.u32 %v84_v25, 7  ;;  %v1945_v36 = vpack.c.bf16 %v1293_v32, %v1292_v29 }
  0x8e   :  { %1864 = vmatpush3.bf16.msra.mxu0 %v1863_v37  ;;  %1912 = vmatpush3.bf16.msra.mxu1 %v1911_v24  ;;  %v86_v30 = vsub.s32 0, %v2403_v26  ;;  %v94_v34 = vsub.s32 2, %v2403_v26  ;;  %v90_v35 = vsub.s32 1, %v2403_v26  ;;  %v98_v37 = vsub.s32 3, %v2403_v26 }
  0x8f   :  { %1866 = vmatprep.subr.bf16.mxu0 %v1865_v44  ;;  %1946 = vmatprep.subr.bf16.mxu1 %v1945_v36 }
  0x90   :  { %v2427_v38 = vrot.slane %v2421_v33, %v86_v30  ;;  %v2430_v39 = vrot.slane %v2421_v33, %v94_v34  ;;  %v2433_v40 = vrot.slane %v2421_v33, %v90_v35  ;;  %v2436_v41 = vrot.slane %v2421_v33, %v98_v37 }
  0x92   :  { %1868 = vmatpush3.bf16.msra.mxu0 %v1867_v49 }
  0x93   :  { %1870 = vmatprep.subr.bf16.mxu0 %v1869_v56 }
  0x96   :  { %1872 = vmatpush3.bf16.msra.mxu0 %v1871_v61 }
  0x97   :  { %1874 = vmatprep.subr.bf16.mxu0 %v1873_v4 }
  0x9a   :  { %1876 = vmatpush3.bf16.msra.mxu0 %v1875_v9 }
  0x9b   :  { %1878 = vmatprep.subr.bf16.mxu0 %v1877_v16 }
  0x9e   :  { %1880 = vmatpush3.bf16.msra.mxu0 %v1879_v21 }
  0x9f   :  { %1914 = vmatprep.subr.bf16.mxu0 %v1913_v31 }
  0xe4   :  { %v343_v42 = vpop.f32.mrb[0].mxu0  ;;  %v456_v44 = vpop.f32.mrb[0].mxu1 }
  0xe5   :  { %v344_v43 = vadd.f32 %v343_v42, %v2427_v38  ;;  %v345_v45 = vpop.f32.mrb[1].mxu0  ;;  %v457_v46 = vadd.f32 %v456_v44, %v2430_v39  ;;  %v458_v48 = vpop.f32.mrb[1].mxu1 }
  0xe6   :  { %v346_v47 = vadd.f32 %v345_v45, %v2433_v40  ;;  %v347_v49 = vpop.f32.mrb[2].mxu0  ;;  %v459_v50 = vadd.f32 %v458_v48, %v2436_v41  ;;  %v460_v52 = vpop.f32.mrb[2].mxu1 }
  0xe7   :  { %v348_v51 = vadd.f32 %v347_v49, %v2427_v38  ;;  %v349_v53 = vpop.f32.mrb[3].mxu0  ;;  %v763_v54 = vmax.f32 %v457_v46, 0.0  ;;  %v461_v55 = vadd.f32 %v460_v52, %v2430_v39  ;;  %v462_v57 = vpop.f32.mrb[3].mxu1  ;;  %v761_v58 = vmax.f32 %v344_v43, 0.0 }
  0xe8   :  { %v350_v56 = vadd.f32 %v349_v53, %v2433_v40  ;;  %v764_v59 = vmax.f32 %v459_v50, 0.0  ;;  %v463_v61 = vadd.f32 %v462_v57, %v2436_v41  ;;  %v762_v62 = vmax.f32 %v346_v47, 0.0 }
  0xe9   :  { %v769_v60 = vmax.f32 %v348_v51, 0.0  ;;  %v771_v63 = vmax.f32 %v461_v55, 0.0  ;;  %v102_v57 = vsub.s32 4, %v2403_v26 }
  0xea   :  { %v770_v0 = vmax.f32 %v350_v56, 0.0  ;;  %v772_v2 = vmax.f32 %v463_v61, 0.0 }
  0xeb   :  { %v905_v1 = vadd.f32 %v769_v60, %v761_v58  ;;  %v919_v3 = vadd.f32 %v771_v63, %v763_v54 }
  0xec   :  { %v912_v4 = vadd.f32 %v770_v0, %v762_v62  ;;  %v353_v5 = vpop.f32.mrb[4].mxu0  ;;  %v926_v6 = vadd.f32 %v772_v2, %v764_v59  ;;  %v466_v8 = vpop.f32.mrb[4].mxu1 }
  0xed   :  { %v354_v7 = vadd.f32 %v353_v5, %v2427_v38  ;;  %v355_v9 = vpop.f32.mrb[5].mxu0  ;;  %v467_v10 = vadd.f32 %v466_v8, %v2430_v39  ;;  %v468_v12 = vpop.f32.mrb[5].mxu1 }
  0xee   :  { %v356_v11 = vadd.f32 %v355_v9, %v2433_v40  ;;  %v357_v13 = vpop.f32.mrb[6].mxu0  ;;  %v469_v15 = vadd.f32 %v468_v12, %v2436_v41  ;;  %v470_v17 = vpop.f32.mrb[6].mxu1 }
  0xef   :  { %v777_v14 = vmax.f32 %v354_v7, 0.0  ;;  %v358_v16 = vadd.f32 %v357_v13, %v2427_v38  ;;  %v359_v18 = vpop.f32.mrb[7].mxu0  ;;  %v779_v19 = vmax.f32 %v467_v10, 0.0  ;;  %v471_v21 = vadd.f32 %v470_v17, %v2430_v39  ;;  %v472_v23 = vpop.f32.mrb[7].mxu1 }
  0xf0   :  { %v778_v20 = vmax.f32 %v356_v11, 0.0  ;;  %v360_v22 = vadd.f32 %v359_v18, %v2433_v40  ;;  %v780_v25 = vmax.f32 %v469_v15, 0.0  ;;  %v473_v28 = vadd.f32 %v472_v23, %v2436_v41 }
  0xf1   :  { %v906_v24 = vadd.f32 %v905_v1, %v777_v14  ;;  %v785_v27 = vmax.f32 %v358_v16, 0.0  ;;  %v920_v29 = vadd.f32 %v919_v3, %v779_v19  ;;  %v787_v31 = vmax.f32 %v471_v21, 0.0 }
  0xf2   :  { %v913_v30 = vadd.f32 %v912_v4, %v778_v20  ;;  %v786_v32 = vmax.f32 %v360_v22, 0.0  ;;  %v927_v34 = vadd.f32 %v926_v6, %v780_v25  ;;  %v788_v36 = vmax.f32 %v473_v28, 0.0 }
  0xf3   :  { %v907_v35 = vadd.f32 %v906_v24, %v785_v27  ;;  %v921_v37 = vadd.f32 %v920_v29, %v787_v31  ;;  %v106_v10 = vsub.s32 5, %v2403_v26  ;;  %v2466_v18 = vrot.slane %v2421_v33, %v102_v57  ;;  %v2506_v57 = vld [vmem:[%s3086_s3 + $0x290] sm:$0xff] }
  0xf4   :  { %v914_v42 = vadd.f32 %v913_v30, %v786_v32  ;;  %v363_v43 = vpop.f32.mrb[8].mxu0  ;;  %v928_v44 = vadd.f32 %v927_v34, %v788_v36  ;;  %v476_v46 = vpop.f32.mrb[8].mxu1  ;;  %v110_v23 = vsub.s32 6, %v2403_v26  ;;  %v114_v24 = vsub.s32 7, %v2403_v26 }
  0xf5   :  { %v364_v45 = vadd.f32 %v363_v43, %v2427_v38  ;;  %v365_v47 = vpop.f32.mrb[9].mxu0  ;;  %v477_v48 = vadd.f32 %v476_v46, %v2430_v39  ;;  %v478_v50 = vpop.f32.mrb[9].mxu1  ;;  %v2475_v31 = vrot.slane %v2421_v33, %v106_v10  ;;  %v2488_v46 = vld [vmem:[%s3086_s3 + $0x208] sm:$0xff]  ;;  %v2549_v10 = vld [vmem:[%s3086_s3 + $0x318] sm:$0xff] }
  0xf6   :  { %v366_v49 = vadd.f32 %v365_v47, %v2433_v40  ;;  %v367_v51 = vpop.f32.mrb[10].mxu0  ;;  %v479_v53 = vadd.f32 %v478_v50, %v2436_v41  ;;  %v480_v55 = vpop.f32.mrb[10].mxu1 }
  0xf7   :  { %v793_v52 = vmax.f32 %v364_v45, 0.0  ;;  %v368_v54 = vadd.f32 %v367_v51, %v2427_v38  ;;  %v369_v56 = vpop.f32.mrb[11].mxu0  ;;  %v795_v58 = vmax.f32 %v477_v48, 0.0  ;;  %v481_v60 = vadd.f32 %v480_v55, %v2430_v39  ;;  %v482_v62 = vpop.f32.mrb[11].mxu1  ;;  %v2483_v45 = vld [vmem:[%s3086_s3 + $0x200] sm:$0xff] }
  0xf8   :  { %v794_v59 = vmax.f32 %v366_v49, 0.0  ;;  %v370_v61 = vadd.f32 %v369_v56, %v2433_v40  ;;  %v796_v0 = vmax.f32 %v479_v53, 0.0  ;;  %v483_v2 = vadd.f32 %v482_v62, %v2436_v41  ;;  %v2493_v51 = vld [vmem:[%s3086_s3 + $0x300] sm:$0xff] }
  0xf9   :  { %v908_v63 = vadd.f32 %v907_v35, %v793_v52  ;;  %v801_v1 = vmax.f32 %v368_v54, 0.0  ;;  %v922_v3 = vadd.f32 %v921_v37, %v795_v58  ;;  %v803_v5 = vmax.f32 %v481_v60, 0.0  ;;  %v2498_v52 = vld [vmem:[%s3086_s3 + $0x308] sm:$0xff]  ;;  %v2511_v58 = vld [vmem:[%s3086_s3 + $0x298] sm:$0xff] }
  0xfa   :  { %v915_v4 = vadd.f32 %v914_v42, %v794_v59  ;;  %v802_v6 = vmax.f32 %v370_v61, 0.0  ;;  %v929_v7 = vadd.f32 %v928_v44, %v796_v0  ;;  %v804_v9 = vmax.f32 %v483_v2, 0.0  ;;  %v2521_v0 = vld [vmem:[%s3086_s3 + $0x390] sm:$0xff] }
  0xfb   :  { %v909_v8 = vadd.f32 %v908_v63, %v801_v1  ;;  %v923_v11 = vadd.f32 %v922_v3, %v803_v5  ;;  %v2501_v56 = vrot.slane %v2421_v33, %v110_v23  ;;  %v2514_v62 = vrot.slane %v2421_v33, %v114_v24  ;;  %v2526_v1 = vld [vmem:[%s3086_s3 + $0x398] sm:$0xff]  ;;  %v2531_v2 = vld [vmem:[%s3086_s3 + $0x210] sm:$0xff] }
  0xfc   :  { %v916_v12 = vadd.f32 %v915_v4, %v802_v6  ;;  %v373_v13 = vpop.f32.mrb[12].mxu0  ;;  %v930_v14 = vadd.f32 %v929_v7, %v804_v9  ;;  %v486_v16 = vpop.f32.mrb[12].mxu1  ;;  %v1915_v63 = vpack.c.bf16 %v2488_v46, %v2483_v45  ;;  %v1947_v7 = vpack.c.bf16 %v2498_v52, %v2493_v51  ;;  %v2544_v9 = vld [vmem:[%s3086_s3 + $0x310] sm:$0xff]  ;;  %v2731_v52 = vld [vmem:[%s3086_s3 + $0x3b8] sm:$0xff] }
  0xfd   :  { %v374_v15 = vadd.f32 %v373_v13, %v2427_v38  ;;  %v375_v17 = vpop.f32.mrb[13].mxu0  ;;  %v487_v19 = vadd.f32 %v486_v16, %v2430_v39  ;;  %v488_v21 = vpop.f32.mrb[13].mxu1  ;;  %v2720_v45 = vld [vmem:[%s3086_s3 + $0x3b0] sm:$0xff]  ;;  %v3090_v51 = vpack.c.bf16 %v2526_v1, %v2521_v0 }
  0xfe   :  { %v376_v20 = vadd.f32 %v375_v17, %v2433_v40  ;;  %v377_v22 = vpop.f32.mrb[14].mxu0  ;;  %v489_v27 = vadd.f32 %v488_v21, %v2436_v41  ;;  %v490_v29 = vpop.f32.mrb[14].mxu1  ;;  %v2557_v17 = vld [vmem:[%s3086_s3 + $0x2a0] sm:$0xff] }
  0xff   :  { %v809_v25 = vmax.f32 %v374_v15, 0.0  ;;  %v378_v28 = vadd.f32 %v377_v22, %v2427_v38  ;;  %v379_v30 = vpop.f32.mrb[15].mxu0  ;;  %v811_v32 = vmax.f32 %v487_v19, 0.0  ;;  %v491_v35 = vadd.f32 %v490_v29, %v2430_v39  ;;  %v492_v37 = vpop.f32.mrb[15].mxu1  ;;  %v2562_v19 = vld [vmem:[%s3086_s3 + $0x2a8] sm:$0xff] }
 0x100   :  { %v810_v34 = vmax.f32 %v376_v20, 0.0  ;;  %v380_v36 = vadd.f32 %v379_v30, %v2433_v40  ;;  %v812_v43 = vmax.f32 %v489_v27, 0.0  ;;  %v493_v44 = vadd.f32 %v492_v37, %v2436_v41 }
 0x101   :  { %v910_v42 = vadd.f32 %v909_v8, %v809_v25  ;;  %v817_v26 = vmax.f32 %v378_v28, 0.0  ;;  %v924_v47 = vadd.f32 %v923_v11, %v811_v32  ;;  %v819_v49 = vmax.f32 %v491_v35, 0.0  ;;  %v2539_v8 = vld [vmem:[%s3086_s3 + $0x218] sm:$0xff] }
 0x102   :  { %v917_v48 = vadd.f32 %v916_v12, %v810_v34  ;;  %v818_v50 = vmax.f32 %v380_v36, 0.0  ;;  %v931_v53 = vadd.f32 %v930_v14, %v812_v43  ;;  %v820_v55 = vmax.f32 %v493_v44, 0.0 }
 0x103   :  { %v911_v54 = vadd.f32 %v910_v42, %v817_v26  ;;  %v925_v59 = vadd.f32 %v924_v47, %v819_v49  ;;  %v2580_v47 = vld [vmem:[%s3086_s3 + $0x3a0] sm:$0xff] }
 0x104   :  { %v918_v60 = vadd.f32 %v917_v48, %v818_v50  ;;  %v383_v61 = vpop.f32.mrb[16].mxu0  ;;  %v932_v3 = vadd.f32 %v931_v53, %v820_v55  ;;  %v496_v5 = vpop.f32.mrb[16].mxu1  ;;  %v2585_v48 = vld [vmem:[%s3086_s3 + $0x3a8] sm:$0xff] }
 0x105   :  { %v1068_v33 = vrot.slane %v911_v54, 4  ;;  %v384_v4 = vadd.f32 %v383_v61, %v2427_v38  ;;  %v385_v6 = vpop.f32.mrb[17].mxu0  ;;  %v1080_v11 = vrot.slane %v925_v59, 4  ;;  %v497_v13 = vadd.f32 %v496_v5, %v2430_v39  ;;  %v498_v14 = vpop.f32.mrb[17].mxu1 }
 0x106   :  { %v1074_v12 = vrot.slane %v918_v60, 4  ;;  %v387_v15 = vpop.f32.mrb[18].mxu0  ;;  %v1086_v21 = vrot.slane %v932_v3, 4  ;;  %v499_v22 = vadd.f32 %v498_v14, %v2436_v41  ;;  %v500_v23 = vpop.f32.mrb[18].mxu1  ;;  %v386_v28 = vadd.f32 %v385_v6, %v2433_v40 }
 0x107   :  { %v1069_v20 = vadd.f32 %v1068_v33, %v911_v54  ;;  %v389_v24 = vpop.f32.mrb[19].mxu0  ;;  %v1081_v27 = vadd.f32 %v1080_v11, %v925_v59  ;;  %v502_v29 = vpop.f32.mrb[19].mxu1  ;;  %v825_v35 = vmax.f32 %v384_v4, 0.0  ;;  %v388_v36 = vadd.f32 %v387_v15, %v2427_v38 }
 0x108   :  { %v1075_v34 = vadd.f32 %v1074_v12, %v918_v60  ;;  %v827_v43 = vmax.f32 %v497_v13, 0.0  ;;  %v501_v26 = vadd.f32 %v500_v23, %v2430_v39  ;;  %v390_v44 = vadd.f32 %v389_v24, %v2433_v40 }
 0x109   :  { %v1070_v42 = vrot.slane %v1069_v20, 2  ;;  %v1087_v49 = vadd.f32 %v1086_v21, %v932_v3  ;;  %v828_v50 = vmax.f32 %v499_v22, 0.0  ;;  %v833_v53 = vmax.f32 %v388_v36, 0.0 }
 0x10a   :  { %v503_v54 = vadd.f32 %v502_v29, %v2436_v41  ;;  %v1082_v55 = vrot.slane %v1081_v27, 2  ;;  %v826_v59 = vmax.f32 %v386_v28, 0.0  ;;  %v835_v60 = vmax.f32 %v501_v26, 0.0 }
 0x10b   :  { %v834_v61 = vmax.f32 %v390_v44, 0.0  ;;  %v1076_v4 = vrot.slane %v1075_v34, 2  ;;  %v961_v5 = vadd.f32 %v833_v53, %v825_v35  ;;  %v2590_v14 = vadd.f32 %v1070_v42, %v1069_v20 }
 0x10c   :  { %v393_v33 = vpop.f32.mrb[20].mxu0  ;;  %v836_v6 = vmax.f32 %v503_v54, 0.0  ;;  %v506_v11 = vpop.f32.mrb[20].mxu1  ;;  %v975_v3 = vadd.f32 %v835_v60, %v827_v43  ;;  %v1088_v24 = vrot.slane %v1087_v49, 2  ;;  %v2595_v44 = vadd.f32 %v1082_v55, %v1081_v27 }
 0x10d   :  { %v395_v12 = vpop.f32.mrb[21].mxu0  ;;  %v968_v15 = vadd.f32 %v834_v61, %v826_v59  ;;  %v394_v21 = vadd.f32 %v393_v33, %v2427_v38  ;;  %v508_v22 = vpop.f32.mrb[21].mxu1  ;;  %v507_v29 = vadd.f32 %v506_v11, %v2430_v39  ;;  %v2599_v54 = vadd.f32 %v1076_v4, %v1075_v34 }
 0x10e   :  { %v397_v23 = vpop.f32.mrb[22].mxu0  ;;  %v982_v28 = vadd.f32 %v836_v6, %v828_v50  ;;  %v396_v35 = vadd.f32 %v395_v12, %v2433_v40  ;;  %v510_v36 = vpop.f32.mrb[22].mxu1  ;;  %v509_v20 = vadd.f32 %v508_v22, %v2436_v41  ;;  %v1072_v61 = vrot.slane %v2590_v14, 1 }
 0x10f   :  { %v399_v26 = vpop.f32.mrb[23].mxu0  ;;  %v841_v53 = vmax.f32 %v394_v21, 0.0  ;;  %v398_v42 = vadd.f32 %v397_v23, %v2427_v38  ;;  %v512_v43 = vpop.f32.mrb[23].mxu1  ;;  %v843_v59 = vmax.f32 %v507_v29, 0.0  ;;  %v511_v50 = vadd.f32 %v510_v36, %v2430_v39 }
 0x110   :  { %v842_v60 = vmax.f32 %v396_v35, 0.0  ;;  %v844_v6 = vmax.f32 %v509_v20, 0.0  ;;  %v400_v21 = vadd.f32 %v399_v26, %v2433_v40  ;;  %v2604_v22 = vadd.f32 %v1088_v24, %v1087_v49 }
 0x111   :  { %v962_v33 = vadd.f32 %v961_v5, %v841_v53  ;;  %v849_v11 = vmax.f32 %v398_v42, 0.0  ;;  %v976_v12 = vadd.f32 %v975_v3, %v843_v59  ;;  %v851_v55 = vmax.f32 %v511_v50, 0.0 }
 0x112   :  { %v969_v27 = vadd.f32 %v968_v15, %v842_v60  ;;  %v983_v23 = vadd.f32 %v982_v28, %v844_v6  ;;  %v513_v34 = vadd.f32 %v512_v43, %v2436_v41  ;;  %v1084_v29 = vrot.slane %v2595_v44, 1 }
 0x113   :  { %v963_v13 = vadd.f32 %v962_v33, %v849_v11  ;;  %v977_v35 = vadd.f32 %v976_v12, %v851_v55  ;;  %v850_v36 = vmax.f32 %v400_v21, 0.0  ;;  %v1078_v28 = vrot.slane %v2599_v54, 1 }
 0x114   :  { %v403_v4 = vpop.f32.mrb[24].mxu0  ;;  %v516_v53 = vpop.f32.mrb[24].mxu1  ;;  %v852_v3 = vmax.f32 %v513_v34, 0.0  ;;  %v2618_v34 = vld [vmem:[%s3086_s3 + $0x220] sm:$0xff] }
 0x115   :  { %v404_v5 = vadd.f32 %v403_v4, %v2427_v38  ;;  %v405_v20 = vpop.f32.mrb[25].mxu0  ;;  %v517_v15 = vadd.f32 %v516_v53, %v2430_v39  ;;  %v518_v49 = vpop.f32.mrb[25].mxu1  ;;  %v970_v42 = vadd.f32 %v969_v27, %v850_v36  ;;  %v2624_v53 = vld [vmem:[%s3086_s3 + $0x228] sm:$0xff] }
 0x116   :  { %v406_v26 = vadd.f32 %v405_v20, %v2433_v40  ;;  %v407_v24 = vpop.f32.mrb[26].mxu0  ;;  %v519_v59 = vadd.f32 %v518_v49, %v2436_v41  ;;  %v520_v50 = vpop.f32.mrb[26].mxu1  ;;  %v984_v6 = vadd.f32 %v983_v23, %v852_v3  ;;  %v2629_v23 = vld [vmem:[%s3086_s3 + $0x320] sm:$0xff]  ;;  %v2634_v20 = vld [vmem:[%s3086_s3 + $0x328] sm:$0xff] }
 0x117   :  { %v857_v43 = vmax.f32 %v404_v5, 0.0  ;;  %v408_v60 = vadd.f32 %v407_v24, %v2427_v38  ;;  %v409_v33 = vpop.f32.mrb[27].mxu0  ;;  %v859_v11 = vmax.f32 %v517_v15, 0.0  ;;  %v521_v55 = vadd.f32 %v520_v50, %v2430_v39  ;;  %v522_v21 = vpop.f32.mrb[27].mxu1 }
 0x118   :  { %v858_v12 = vmax.f32 %v406_v26, 0.0  ;;  %v860_v27 = vmax.f32 %v519_v59, 0.0  ;;  %v410_v5 = vadd.f32 %v409_v33, %v2433_v40  ;;  %v523_v26 = vadd.f32 %v522_v21, %v2436_v41 }
 0x119   :  { %v964_v4 = vadd.f32 %v963_v13, %v857_v43  ;;  %v865_v36 = vmax.f32 %v408_v60, 0.0  ;;  %v978_v13 = vadd.f32 %v977_v35, %v859_v11  ;;  %v867_v15 = vmax.f32 %v521_v55, 0.0 }
 0x11a   :  { %v971_v3 = vadd.f32 %v970_v42, %v858_v12  ;;  %v985_v49 = vadd.f32 %v984_v6, %v860_v27  ;;  %v866_v43 = vmax.f32 %v410_v5, 0.0  ;;  %v1090_v59 = vrot.slane %v2604_v22, 1 }
 0x11b   :  { %v965_v24 = vadd.f32 %v964_v4, %v865_v36  ;;  %v979_v60 = vadd.f32 %v978_v13, %v867_v15  ;;  %v868_v50 = vmax.f32 %v523_v26, 0.0  ;;  %v1073_v35 = vadd.f32 %v1072_v61, %v2590_v14 }
 0x11c   :  { %v413_v33 = vpop.f32.mrb[28].mxu0  ;;  %v1085_v42 = vadd.f32 %v1084_v29, %v2595_v44  ;;  %v972_v11 = vadd.f32 %v971_v3, %v866_v43  ;;  %v526_v12 = vpop.f32.mrb[28].mxu1  ;;  %v1079_v13 = vadd.f32 %v1078_v28, %v2599_v54  ;;  %v1091_v29 = vadd.f32 %v1090_v59, %v2604_v22 }
 0x11d   :  { %v414_v6 = vadd.f32 %v413_v33, %v2427_v38  ;;  %v415_v55 = vpop.f32.mrb[29].mxu0  ;;  %v986_v21 = vadd.f32 %v985_v49, %v868_v50  ;;  %v527_v4 = vadd.f32 %v526_v12, %v2430_v39  ;;  %v528_v36 = vpop.f32.mrb[29].mxu1 }
 0x11e   :  { %v416_v27 = vadd.f32 %v415_v55, %v2433_v40  ;;  %v417_v5 = vpop.f32.mrb[30].mxu0  ;;  %v529_v26 = vadd.f32 %v528_v36, %v2436_v41  ;;  %v530_v44 = vpop.f32.mrb[30].mxu1 }
 0x11f   :  { %v873_v15 = vmax.f32 %v414_v6, 0.0  ;;  %v418_v14 = vadd.f32 %v417_v5, %v2427_v38  ;;  %v419_v61 = vpop.f32.mrb[31].mxu0  ;;  %v875_v3 = vmax.f32 %v527_v4, 0.0  ;;  %v531_v49 = vadd.f32 %v530_v44, %v2430_v39  ;;  %v532_v33 = vpop.f32.mrb[31].mxu1 }
 0x120   :  { %v874_v43 = vmax.f32 %v416_v27, 0.0  ;;  %v420_v50 = vadd.f32 %v419_v61, %v2433_v40  ;;  %v876_v55 = vmax.f32 %v529_v26, 0.0  ;;  %v533_v54 = vadd.f32 %v532_v33, %v2436_v41 }
 0x121   :  { %v966_v12 = vadd.f32 %v965_v24, %v873_v15  ;;  %v881_v32 = vmax.f32 %v418_v14, 0.0  ;;  %v980_v28 = vadd.f32 %v979_v60, %v875_v3  ;;  %v883_v36 = vmax.f32 %v531_v49, 0.0 }
 0x122   :  { %v973_v6 = vadd.f32 %v972_v11, %v874_v43  ;;  %v882_v38 = vmax.f32 %v420_v50, 0.0  ;;  %v2654_v5 = vmul.f32 0.015625, %v1073_v35  ;;  %v987_v37 = vadd.f32 %v986_v21, %v876_v55 }
 0x123   :  { %v967_v22 = vadd.f32 %v966_v12, %v881_v32  ;;  %v884_v59 = vmax.f32 %v533_v54, 0.0  ;;  %v2656_v4 = vmul.f32 0.015625, %v1085_v42  ;;  %v981_v39 = vadd.f32 %v980_v28, %v883_v36 }
 0x124   :  { %v974_v27 = vadd.f32 %v973_v6, %v882_v38  ;;  %v569_v40 = vpop.f32.mrb[32].mxu0  ;;  %v2658_v44 = vmul.f32 0.015625, %v1079_v13  ;;  %v682_v60 = vpop.f32.mrb[32].mxu1  ;;  %v2661_v26 = vmul.f32 0.015625, %v1091_v29 }
 0x125   :  { %v1116_v24 = vrot.slane %v967_v22, 4  ;;  %v988_v15 = vadd.f32 %v987_v37, %v884_v59  ;;  %v570_v41 = vadd.f32 %v569_v40, %v2466_v18  ;;  %v571_v11 = vpop.f32.mrb[33].mxu0  ;;  %v1128_v35 = vrot.slane %v981_v39, 4  ;;  %v684_v21 = vpop.f32.mrb[33].mxu1 }
 0x126   :  { %v1122_v14 = vrot.slane %v974_v27, 4  ;;  %v683_v32 = vadd.f32 %v682_v60, %v2501_v56  ;;  %v572_v42 = vadd.f32 %v571_v11, %v2475_v31  ;;  %v573_v61 = vpop.f32.mrb[34].mxu0  ;;  %v685_v49 = vadd.f32 %v684_v21, %v2514_v62  ;;  %v686_v37 = vpop.f32.mrb[34].mxu1 }
 0x127   :  { %v1117_v3 = vadd.f32 %v1116_v24, %v967_v22  ;;  %v1134_v43 = vrot.slane %v988_v15, 4  ;;  %v765_v13 = vmax.f32 %v570_v41, 0.0  ;;  %v575_v50 = vpop.f32.mrb[35].mxu0  ;;  %v1129_v33 = vadd.f32 %v1128_v35, %v981_v39  ;;  %v688_v54 = vpop.f32.mrb[35].mxu1 }
 0x128   :  { %v1123_v12 = vadd.f32 %v1122_v14, %v974_v27  ;;  %v767_v55 = vmax.f32 %v683_v32, 0.0  ;;  %v766_v29 = vmax.f32 %v572_v42, 0.0  ;;  %v768_v36 = vmax.f32 %v685_v49, 0.0 }
 0x129   :  { %v1118_v28 = vrot.slane %v1117_v3, 2  ;;  %v1135_v6 = vadd.f32 %v1134_v43, %v988_v15  ;;  %v574_v38 = vadd.f32 %v573_v61, %v2466_v18  ;;  %v1130_v59 = vrot.slane %v1129_v33, 2 }
 0x12a   :  { %v1124_v40 = vrot.slane %v1123_v12, 2  ;;  %v687_v22 = vadd.f32 %v686_v37, %v2501_v56  ;;  %v576_v24 = vadd.f32 %v575_v50, %v2475_v31  ;;  %v689_v39 = vadd.f32 %v688_v54, %v2514_v62 }
 0x12b   :  { %v1119_v41 = vadd.f32 %v1118_v28, %v1117_v3  ;;  %v1136_v60 = vrot.slane %v1135_v6, 2  ;;  %v773_v11 = vmax.f32 %v574_v38, 0.0  ;;  %v1131_v27 = vadd.f32 %v1130_v59, %v1129_v33 }
 0x12c   :  { %v1125_v35 = vadd.f32 %v1124_v40, %v1123_v12  ;;  %v775_v14 = vmax.f32 %v687_v22, 0.0  ;;  %v774_v32 = vmax.f32 %v576_v24, 0.0  ;;  %v579_v42 = vpop.f32.mrb[36].mxu0  ;;  %v776_v61 = vmax.f32 %v689_v39, 0.0  ;;  %v692_v49 = vpop.f32.mrb[36].mxu1 }
 0x12d   :  { %v1120_v15 = vrot.slane %v1119_v41, 1  ;;  %v1137_v21 = vadd.f32 %v1136_v60, %v1135_v6  ;;  %v933_v43 = vadd.f32 %v773_v11, %v765_v13  ;;  %v581_v30 = vpop.f32.mrb[37].mxu0  ;;  %v1132_v25 = vrot.slane %v1131_v27, 1  ;;  %v694_v50 = vpop.f32.mrb[37].mxu1 }
 0x12e   :  { %v947_v37 = vadd.f32 %v775_v14, %v767_v55  ;;  %v940_v16 = vadd.f32 %v774_v32, %v766_v29  ;;  %v580_v3 = vadd.f32 %v579_v42, %v2466_v18  ;;  %v583_v28 = vpop.f32.mrb[38].mxu0  ;;  %v954_v54 = vadd.f32 %v776_v61, %v768_v36  ;;  %v696_v59 = vpop.f32.mrb[38].mxu1 }
 0x12f   :  { %v1121_v38 = vadd.f32 %v1120_v15, %v1119_v41  ;;  %v693_v33 = vadd.f32 %v692_v49, %v2501_v56  ;;  %v582_v12 = vadd.f32 %v581_v30, %v2475_v31  ;;  %v585_v40 = vpop.f32.mrb[39].mxu0  ;;  %v1133_v13 = vadd.f32 %v1132_v25, %v1131_v27  ;;  %v698_v29 = vpop.f32.mrb[39].mxu1 }
 0x130   :  { %v781_v6 = vmax.f32 %v580_v3, 0.0  ;;  %v695_v22 = vadd.f32 %v694_v50, %v2514_v62  ;;  %v584_v55 = vadd.f32 %v583_v28, %v2466_v18  ;;  %v697_v41 = vadd.f32 %v696_v59, %v2501_v56 }
 0x131   :  { %v1172_v24 = vmul.f32 0.015625, %v1121_v38  ;;  %v783_v60 = vmax.f32 %v693_v33, 0.0  ;;  %v782_v11 = vmax.f32 %v582_v12, 0.0  ;;  %v1174_v36 = vmul.f32 0.015625, %v1133_v13 }
 0x132   :  { %v934_v39 = vadd.f32 %v933_v43, %v781_v6  ;;  %v784_v14 = vmax.f32 %v695_v22, 0.0  ;;  %v789_v32 = vmax.f32 %v584_v55, 0.0  ;;  %v791_v15 = vmax.f32 %v697_v41, 0.0 }
 0x133   :  { %v948_v30 = vadd.f32 %v947_v37, %v783_v60  ;;  %v941_v42 = vadd.f32 %v940_v16, %v782_v11  ;;  %v586_v25 = vadd.f32 %v585_v40, %v2475_v31  ;;  %v699_v49 = vadd.f32 %v698_v29, %v2514_v62 }
 0x134   :  { %v955_v27 = vadd.f32 %v954_v54, %v784_v14  ;;  %v935_v61 = vadd.f32 %v934_v39, %v789_v32  ;;  %v589_v3 = vpop.f32.mrb[40].mxu0  ;;  %v1126_v50 = vrot.slane %v1125_v35, 1  ;;  %v702_v12 = vpop.f32.mrb[40].mxu1  ;;  %v1138_v43 = vrot.slane %v1137_v21, 1 }
 0x135   :  { %v949_v28 = vadd.f32 %v948_v30, %v791_v15  ;;  %v790_v38 = vmax.f32 %v586_v25, 0.0  ;;  %v590_v33 = vadd.f32 %v589_v3, %v2466_v18  ;;  %v591_v59 = vpop.f32.mrb[41].mxu0  ;;  %v792_v13 = vmax.f32 %v699_v49, 0.0  ;;  %v704_v6 = vpop.f32.mrb[41].mxu1 }
 0x136   :  { %v703_v37 = vadd.f32 %v702_v12, %v2501_v56  ;;  %v592_v16 = vadd.f32 %v591_v59, %v2475_v31  ;;  %v1127_v40 = vadd.f32 %v1126_v50, %v1125_v35  ;;  %v593_v54 = vpop.f32.mrb[42].mxu0  ;;  %v705_v29 = vadd.f32 %v704_v6, %v2514_v62  ;;  %v706_v11 = vpop.f32.mrb[42].mxu1 }
 0x137   :  { %v942_v22 = vadd.f32 %v941_v42, %v790_v38  ;;  %v797_v55 = vmax.f32 %v590_v33, 0.0  ;;  %v1139_v60 = vadd.f32 %v1138_v43, %v1137_v21  ;;  %v595_v41 = vpop.f32.mrb[43].mxu0  ;;  %v956_v39 = vadd.f32 %v955_v27, %v792_v13  ;;  %v708_v15 = vpop.f32.mrb[43].mxu1  ;;  %v2689_v21 = vld [vmem:[%s3086_s3 + $0x2b0] sm:$0xff]  ;;  %v2694_v27 = vld [vmem:[%s3086_s3 + $0x2b8] sm:$0xff] }
 0x138   :  { %v799_v14 = vmax.f32 %v703_v37, 0.0  ;;  %v798_v32 = vmax.f32 %v592_v16, 0.0  ;;  %v1173_v30 = vmul.f32 0.015625, %v1127_v40  ;;  %v800_v49 = vmax.f32 %v705_v29, 0.0 }
 0x139   :  { %v936_v25 = vadd.f32 %v935_v61, %v797_v55  ;;  %v1175_v3 = vmul.f32 0.015625, %v1139_v60  ;;  %v594_v12 = vadd.f32 %v593_v54, %v2466_v18  ;;  %v707_v50 = vadd.f32 %v706_v11, %v2501_v56 }
 0x13a   :  { %v950_v59 = vadd.f32 %v949_v28, %v799_v14  ;;  %v943_v35 = vadd.f32 %v942_v22, %v798_v32  ;;  %v1333_v42 = vsel %vm1331_vm1, %v1173_v30, %v2658_v44  ;;  %v957_v61 = vadd.f32 %v956_v39, %v800_v49  ;;  %v2757_v49 = vld [vmem:[%s3086_s3 + $0x2c0] sm:$0xff] }
 0x13b   :  { %1412 = vmatprep.mubr.f32.mxu0 %v1333_v42  ;;  %v1335_v28 = vsel %vm1331_vm1, %v1175_v3, %v2661_v26  ;;  %v805_v38 = vmax.f32 %v594_v12, 0.0  ;;  %v1332_v44 = vsel %vm1331_vm1, %v1172_v24, %v2654_v5  ;;  %v807_v33 = vmax.f32 %v707_v50, 0.0  ;;  %v2765_v50 = vld [vmem:[%s3086_s3 + $0x2c8] sm:$0xff] }
 0x13c   :  { %1482 = vmatprep.mubr.f32.mxu1 %v1335_v28  ;;  %1413 = vmatmul.mubr.f32.vlgmr.msra.gmra.mrb[64].mxu0 %v1332_v44  ;;  %v1334_v43 = vsel %vm1331_vm1, %v1174_v36, %v2656_v4  ;;  %v596_v13 = vadd.f32 %v595_v41, %v2475_v31  ;;  %v709_v37 = vadd.f32 %v708_v15, %v2514_v62  ;;  %v599_v16 = vpop.f32.mrb[44].mxu0  ;;  %v712_v26 = vpop.f32.mrb[44].mxu1  ;;  %v2747_v15 = vld [vmem:[%s3086_s3 + $0x330] sm:$0xff]  ;;  %v2775_v28 = vld [vmem:[%s3086_s3 + $0x3c8] sm:$0xff] }
 0x13d   :  { %v937_v6 = vadd.f32 %v936_v25, %v805_v38  ;;  %1483 = vmatmul.mubr.f32.vlgmr.msra.gmra.mrb[64].mxu1 %v1334_v43  ;;  %v600_v40 = vadd.f32 %v599_v16, %v2466_v18  ;;  %v601_v54 = vpop.f32.mrb[45].mxu0  ;;  %1916 = vmatpush3.bf16.msra.mxu0 %v1915_v63  ;;  %v1925_v5 = vpack.c.bf16 %v2694_v27, %v2689_v21  ;;  %v714_v55 = vpop.f32.mrb[45].mxu1  ;;  %v2752_v25 = vld [vmem:[%s3086_s3 + $0x338] sm:$0xff]  ;;  %v2798_v16 = vld [vmem:[%s3086_s3 + $0x340] sm:$0xff] }
 0x13e   :  { %v951_v24 = vadd.f32 %v950_v59, %v807_v33  ;;  %v806_v4 = vmax.f32 %v596_v13, 0.0  ;;  %v808_v36 = vmax.f32 %v709_v37, 0.0  ;;  %v713_v22 = vadd.f32 %v712_v26, %v2501_v56  ;;  %v603_v29 = vpop.f32.mrb[46].mxu0  ;;  %1948 = vmatpush3.bf16.msra.mxu1 %v1947_v7  ;;  %v716_v39 = vpop.f32.mrb[46].mxu1  ;;  %v2788_v13 = vld [vmem:[%s3086_s3 + $0x240] sm:$0xff]  ;;  %v2793_v37 = vld [vmem:[%s3086_s3 + $0x248] sm:$0xff] }
 0x13f   :  { %v3089_v60 = vpack.c.bf16 %v2511_v58, %v2506_v57  ;;  %v813_v46 = vmax.f32 %v600_v40, 0.0  ;;  %v602_v63 = vadd.f32 %v601_v54, %v2475_v31  ;;  %v715_v11 = vadd.f32 %v714_v55, %v2514_v62  ;;  %v605_v14 = vpop.f32.mrb[47].mxu0  ;;  %1950 = vmatprep.subr.bf16.mxu1 %v3090_v51  ;;  %v2736_v57 = vld [vmem:[%s3086_s3 + $0x230] sm:$0xff]  ;;  %v2741_v58 = vld [vmem:[%s3086_s3 + $0x238] sm:$0xff]  ;;  %v718_v1 = vpop.f32.mrb[47].mxu1 }
 0x140   :  { %v604_v41 = vadd.f32 %v603_v29, %v2466_v18  ;;  %v944_v7 = vadd.f32 %v943_v35, %v806_v4  ;;  %v958_v32 = vadd.f32 %v957_v61, %v808_v36  ;;  %v815_v30 = vmax.f32 %v713_v22, 0.0  ;;  %v2770_v61 = vld [vmem:[%s3086_s3 + $0x3c0] sm:$0xff]  ;;  %v2830_v4 = vld [vmem:[%s3086_s3 + $0x3d8] sm:$0xff]  ;;  %v2835_v36 = vld [vmem:[%s3086_s3 + $0x250] sm:$0xff] }
 0x141   :  { %1918 = vmatprep.subr.bf16.mxu0 %v3089_v60  ;;  %v717_v0 = vadd.f32 %v716_v39, %v2501_v56  ;;  %v938_v3 = vadd.f32 %v937_v6, %v813_v46  ;;  %v814_v12 = vmax.f32 %v602_v63, 0.0  ;;  %v816_v59 = vmax.f32 %v715_v11, 0.0  ;;  %v2844_v60 = vld [vmem:[%s3086_s3 + $0x258] sm:$0xff] }
 0x142   :  { %v821_v35 = vmax.f32 %v604_v41, 0.0  ;;  %v3091_v42 = vpack.c.bf16 %v2539_v8, %v2531_v2  ;;  %v952_v38 = vadd.f32 %v951_v24, %v815_v30  ;;  %v606_v2 = vadd.f32 %v605_v14, %v2475_v31  ;;  %v2825_v24 = vld [vmem:[%s3086_s3 + $0x3d0] sm:$0xff]  ;;  %v2854_v46 = vld [vmem:[%s3086_s3 + $0x358] sm:$0xff] }
 0x143   :  { %v823_v44 = vmax.f32 %v717_v0, 0.0  ;;  %v719_v8 = vadd.f32 %v718_v1, %v2514_v62  ;;  %v3092_v33 = vpack.c.bf16 %v2549_v10, %v2544_v9  ;;  %v3093_v43 = vpack.c.bf16 %v2562_v19, %v2557_v17  ;;  %v2803_v9 = vld [vmem:[%s3086_s3 + $0x348] sm:$0xff]  ;;  %v2808_v10 = vld [vmem:[%s3086_s3 + $0x2d0] sm:$0xff]  ;;  %v2813_v17 = vld [vmem:[%s3086_s3 + $0x2d8] sm:$0xff] }
 0x144   :  { %1920 = vmatpush3.bf16.msra.mxu0 %v3091_v42  ;;  %v945_v19 = vadd.f32 %v944_v7, %v814_v12  ;;  %v959_v6 = vadd.f32 %v958_v32, %v816_v59  ;;  %v2815_v40 = vadd.f32 %v938_v3, %v821_v35  ;;  %v3094_v26 = vpack.c.bf16 %v2585_v48, %v2580_v47  ;;  %v609_v55 = vpop.f32.mrb[48].mxu0  ;;  %v722_v11 = vpop.f32.mrb[48].mxu1  ;;  %v2919_v12 = vld [vmem:[%s3086_s3 + $0x360] sm:$0xff]  ;;  %v2924_v59 = vld [vmem:[%s3086_s3 + $0x368] sm:$0xff] }
 0x145   :  { %1952 = vmatpush3.bf16.msra.mxu1 %v3092_v33  ;;  %1922 = vmatprep.subr.bf16.mxu0 %v3093_v43  ;;  %v1957_v54 = vpack.c.bf16 %v2731_v52, %v2720_v45  ;;  %v2837_v47 = vadd.f32 %v952_v38, %v823_v44  ;;  %v822_v48 = vmax.f32 %v606_v2, 0.0  ;;  %v824_v22 = vmax.f32 %v719_v8, 0.0  ;;  %v2849_v45 = vld [vmem:[%s3086_s3 + $0x350] sm:$0xff]  ;;  %v611_v41 = vpop.f32.mrb[49].mxu0  ;;  %v724_v30 = vpop.f32.mrb[49].mxu1  ;;  %v2942_v44 = vld [vmem:[%s3086_s3 + $0x2f8] sm:$0xff] }
 0x146   :  { %1954 = vmatprep.subr.bf16.mxu1 %v3094_v26  ;;  %v1927_v29 = vpack.c.bf16 %v2741_v58, %v2736_v57  ;;  %v2857_v63 = vadd.f32 %v609_v55, %v2466_v18  ;;  %v3095_v39 = vpack.c.bf16 %v2624_v53, %v2618_v34  ;;  %v1959_v14 = vpack.c.bf16 %v2752_v25, %v2747_v15  ;;  %v2871_v57 = vld [vmem:[%s3086_s3 + $0x2e0] sm:$0xff]  ;;  %v2876_v58 = vld [vmem:[%s3086_s3 + $0x2e8] sm:$0xff]  ;;  %v613_v0 = vpop.f32.mrb[50].mxu0  ;;  %v2937_v38 = vld [vmem:[%s3086_s3 + $0x2f0] sm:$0xff] }
 0x147   :  { %v1929_v51 = vpack.c.bf16 %v2765_v50, %v2757_v49  ;;  %v1961_v52 = vpack.c.bf16 %v2775_v28, %v2770_v61  ;;  %v2881_v34 = vld [vmem:[%s3086_s3 + $0x3e0] sm:$0xff]  ;;  %v2883_v53 = vadd.f32 %v945_v19, %v822_v48  ;;  %v2885_v7 = vadd.f32 %v959_v6, %v824_v22  ;;  %v2897_v15 = vld [vmem:[%s3086_s3 + $0x3e8] sm:$0xff]  ;;  %v615_v21 = vpop.f32.mrb[51].mxu0  ;;  %v2947_v2 = vld [vmem:[%s3086_s3 + $0x3f0] sm:$0xff] }
 0x148   :  { %1924 = vmatpush3.bf16.msra.mxu0 %v3095_v39  ;;  %v723_v32 = vadd.f32 %v722_v11, %v2501_v56  ;;  %v3096_v1 = vpack.c.bf16 %v2634_v20, %v2629_v23  ;;  %v2902_v25 = vld [vmem:[%s3086_s3 + $0x260] sm:$0xff]  ;;  %v2907_v49 = vld [vmem:[%s3086_s3 + $0x268] sm:$0xff]  ;;  %v725_v23 = vadd.f32 %v724_v30, %v2514_v62  ;;  %v726_v20 = vpop.f32.mrb[50].mxu1  ;;  %v1931_v27 = vpack.c.bf16 %v2793_v37, %v2788_v13  ;;  %v2958_v37 = vld [vmem:[%s3086_s3 + $0x3f8] sm:$0xff] }
 0x149   :  { %1926 = vmatprep.subr.bf16.mxu0 %v1925_v5  ;;  %v1963_v5 = vpack.c.bf16 %v2803_v9, %v2798_v16  ;;  %v1933_v3 = vpack.c.bf16 %v2813_v17, %v2808_v10  ;;  %v728_v35 = vpop.f32.mrb[51].mxu1  ;;  %v1965_v42 = vpack.c.bf16 %v2830_v4, %v2825_v24  ;;  %v1935_v50 = vpack.c.bf16 %v2844_v60, %v2835_v36  ;;  %v2963_v16 = vld [vmem:[%s3086_s3 + $0x270] sm:$0xff]  ;;  %v2968_v9 = vld [vmem:[%s3086_s3 + $0x278] sm:$0xff] }
 0x14a   :  { %1956 = vmatpush3.bf16.msra.mxu1 %v3096_v1  ;;  %v1967_v61 = vpack.c.bf16 %v2854_v46, %v2849_v45  ;;  %v1937_v28 = vpack.c.bf16 %v2876_v58, %v2871_v57  ;;  %v612_v8 = vadd.f32 %v611_v41, %v2475_v31  ;;  %v614_v33 = vadd.f32 %v613_v0, %v2466_v18  ;;  %v2979_v48 = vld [vmem:[%s3086_s3 + $0x370] sm:$0xff]  ;;  %v2984_v22 = vld [vmem:[%s3086_s3 + $0x378] sm:$0xff] }
 0x14b   :  { %1958 = vmatprep.subr.bf16.mxu1 %v1957_v54  ;;  %v1969_v43 = vpack.c.bf16 %v2897_v15, %v2881_v34  ;;  %v1939_v13 = vpack.c.bf16 %v2907_v49, %v2902_v25  ;;  %v829_v10 = vmax.f32 %v2857_v63, 0.0  ;;  %v831_v17 = vmax.f32 %v723_v32, 0.0 }
 0x14c   :  { %1928 = vmatpush3.bf16.msra.mxu0 %v1927_v29  ;;  %v727_v19 = vadd.f32 %v726_v20, %v2501_v56  ;;  %v1971_v6 = vpack.c.bf16 %v2924_v59, %v2919_v12  ;;  %v832_v26 = vmax.f32 %v725_v23, 0.0  ;;  %v837_v54 = vmax.f32 %v614_v33, 0.0  ;;  %v619_v29 = vpop.f32.mrb[52].mxu0  ;;  %v732_v32 = vpop.f32.mrb[52].mxu1 }
 0x14d   :  { %1930 = vmatprep.subr.bf16.mxu0 %v1929_v51  ;;  %v616_v24 = vadd.f32 %v615_v21, %v2475_v31  ;;  %v729_v4 = vadd.f32 %v728_v35, %v2514_v62  ;;  %v1941_v63 = vpack.c.bf16 %v2942_v44, %v2937_v38  ;;  %v1973_v11 = vpack.c.bf16 %v2958_v37, %v2947_v2  ;;  %v621_v30 = vpop.f32.mrb[53].mxu0  ;;  %v734_v20 = vpop.f32.mrb[53].mxu1 }
 0x14e   :  { %1960 = vmatpush3.bf16.msra.mxu1 %v1959_v14  ;;  %v839_v55 = vmax.f32 %v727_v19, 0.0  ;;  %v1943_v41 = vpack.c.bf16 %v2968_v9, %v2963_v16  ;;  %v830_v39 = vmax.f32 %v612_v8, 0.0  ;;  %v989_v14 = vadd.f32 %v837_v54, %v829_v10  ;;  %v623_v21 = vpop.f32.mrb[54].mxu0  ;;  %v736_v54 = vpop.f32.mrb[54].mxu1 }
 0x14f   :  { %1962 = vmatprep.subr.bf16.mxu1 %v1961_v52  ;;  %v838_v51 = vmax.f32 %v616_v24, 0.0  ;;  %v840_v52 = vmax.f32 %v729_v4, 0.0  ;;  %v1092_v0 = vrot.slane %v2815_v40, 4  ;;  %v1104_v1 = vrot.slane %v2837_v47, 4 }
 0x150   :  { %1932 = vmatpush3.bf16.msra.mxu0 %v1931_v27  ;;  %v1003_v23 = vadd.f32 %v839_v55, %v831_v17  ;;  %v620_v10 = vadd.f32 %v619_v29, %v2466_v18  ;;  %v733_v19 = vadd.f32 %v732_v32, %v2501_v56  ;;  %v625_v27 = vpop.f32.mrb[55].mxu0  ;;  %v622_v24 = vadd.f32 %v621_v30, %v2475_v31 }
 0x151   :  { %1934 = vmatprep.subr.bf16.mxu0 %v1933_v3  ;;  %v996_v33 = vadd.f32 %v838_v51, %v830_v39  ;;  %v1010_v8 = vadd.f32 %v840_v52, %v832_v26  ;;  %v735_v17 = vadd.f32 %v734_v20, %v2514_v62  ;;  %v624_v4 = vadd.f32 %v623_v21, %v2466_v18  ;;  %v738_v3 = vpop.f32.mrb[55].mxu1 }
 0x152   :  { %1964 = vmatpush3.bf16.msra.mxu1 %v1963_v5  ;;  %v737_v5 = vadd.f32 %v736_v54, %v2501_v56  ;;  %v845_v55 = vmax.f32 %v620_v10, 0.0  ;;  %v847_v35 = vmax.f32 %v733_v19, 0.0  ;;  %v626_v26 = vadd.f32 %v625_v27, %v2475_v31 }
 0x153   :  { %1966 = vmatprep.subr.bf16.mxu1 %v1965_v42  ;;  %v739_v29 = vadd.f32 %v738_v3, %v2514_v62  ;;  %v846_v42 = vmax.f32 %v622_v24, 0.0  ;;  %v848_v39 = vmax.f32 %v735_v17, 0.0  ;;  %v853_v51 = vmax.f32 %v624_v4, 0.0 }
 0x154   :  { %1936 = vmatpush3.bf16.msra.mxu0 %v1935_v50  ;;  %v855_v52 = vmax.f32 %v737_v5, 0.0  ;;  %v990_v32 = vadd.f32 %v989_v14, %v845_v55  ;;  %v1004_v30 = vadd.f32 %v1003_v23, %v847_v35  ;;  %v854_v20 = vmax.f32 %v626_v26, 0.0  ;;  %v629_v50 = vpop.f32.mrb[56].mxu0  ;;  %v742_v14 = vpop.f32.mrb[56].mxu1 }
 0x155   :  { %1938 = vmatprep.subr.bf16.mxu0 %v1937_v28  ;;  %v856_v21 = vmax.f32 %v739_v29, 0.0  ;;  %v3017_v36 = vadd.f32 %v1092_v0, %v2815_v40  ;;  %v3020_v60 = vadd.f32 %v1104_v1, %v2837_v47  ;;  %v997_v45 = vadd.f32 %v996_v33, %v846_v42  ;;  %v631_v23 = vpop.f32.mrb[57].mxu0 }
 0x156   :  { %1968 = vmatpush3.bf16.msra.mxu1 %v1967_v61  ;;  %v1011_v46 = vadd.f32 %v1010_v8, %v848_v39  ;;  %v1098_v57 = vrot.slane %v2883_v53, 4  ;;  %v991_v58 = vadd.f32 %v990_v32, %v853_v51  ;;  %v1005_v61 = vadd.f32 %v1004_v30, %v855_v52  ;;  %v633_v0 = vpop.f32.mrb[58].mxu0 }
 0x157   :  { %1970 = vmatprep.subr.bf16.mxu1 %v1969_v43  ;;  %v630_v28 = vadd.f32 %v629_v50, %v2466_v18  ;;  %v998_v40 = vadd.f32 %v997_v45, %v854_v20  ;;  %v743_v47 = vadd.f32 %v742_v14, %v2501_v56  ;;  %v632_v15 = vadd.f32 %v631_v23, %v2475_v31  ;;  %v744_v43 = vpop.f32.mrb[57].mxu1 }
 0x158   :  { %1940 = vmatpush3.bf16.msra.mxu0 %v1939_v13  ;;  %v1012_v34 = vadd.f32 %v1011_v46, %v856_v21  ;;  %v1110_v1 = vrot.slane %v2885_v7, 4  ;;  %v745_v33 = vadd.f32 %v744_v43, %v2514_v62  ;;  %v634_v25 = vadd.f32 %v633_v0, %v2466_v18  ;;  %v746_v49 = vpop.f32.mrb[58].mxu1  ;;  %v635_v13 = vpop.f32.mrb[59].mxu0 }
 0x159   :  { %v861_v35 = vmax.f32 %v630_v28, 0.0  ;;  %1942 = vmatprep.subr.bf16.mxu0 %v1941_v63  ;;  %v863_v8 = vmax.f32 %v743_v47, 0.0  ;;  %v862_v12 = vmax.f32 %v632_v15, 0.0  ;;  %v747_v59 = vadd.f32 %v746_v49, %v2501_v56  ;;  %v748_v10 = vpop.f32.mrb[59].mxu1 }
 0x15a   :  { %1972 = vmatpush3.bf16.msra.mxu1 %v1971_v6  ;;  %v636_v6 = vadd.f32 %v635_v13, %v2475_v31  ;;  %v864_v54 = vmax.f32 %v745_v33, 0.0  ;;  %v869_v27 = vmax.f32 %v634_v25, 0.0  ;;  %v749_v24 = vadd.f32 %v748_v10, %v2514_v62 }
 0x15b   :  { %1974 = vmatprep.subr.bf16.mxu1 %v1973_v11  ;;  %v992_v19 = vadd.f32 %v991_v58, %v861_v35  ;;  %v1006_v38 = vadd.f32 %v1005_v61, %v863_v8  ;;  %v999_v44 = vadd.f32 %v998_v40, %v862_v12  ;;  %v871_v2 = vmax.f32 %v747_v59, 0.0 }
 0x15c   :  { %1944 = vmatpush3.bf16.msra.mxu0 %v1943_v41  ;;  %v870_v37 = vmax.f32 %v636_v6, 0.0  ;;  %v3097_v63 = vpack.c.bf16 %v2984_v22, %v2979_v48  ;;  %v1099_v11 = vadd.f32 %v1098_v57, %v2883_v53  ;;  %v1013_v17 = vadd.f32 %v1012_v34, %v864_v54  ;;  %v639_v26 = vpop.f32.mrb[60].mxu0  ;;  %v752_v41 = vpop.f32.mrb[60].mxu1 }
 0x15d   :  { %v993_v4 = vadd.f32 %v992_v19, %v869_v27  ;;  %v872_v5 = vmax.f32 %v749_v24, 0.0  ;;  %v1007_v3 = vadd.f32 %v1006_v38, %v871_v2  ;;  %v1094_v29 = vrot.slane %v3017_v36, 2  ;;  %v641_v42 = vpop.f32.mrb[61].mxu0  ;;  %v754_v51 = vpop.f32.mrb[61].mxu1 }
 0x15e   :  { %1976 = vmatpush3.bf16.msra.mxu1 %v3097_v63  ;;  %v1000_v55 = vadd.f32 %v999_v44, %v870_v37  ;;  %v640_v9 = vadd.f32 %v639_v26, %v2466_v18  ;;  %v1106_v39 = vrot.slane %v3020_v60, 2  ;;  %v1111_v48 = vadd.f32 %v1110_v1, %v2885_v7  ;;  %v643_v52 = vpop.f32.mrb[62].mxu0  ;;  %v756_v45 = vpop.f32.mrb[62].mxu1 }
 0x15f   :  { %v1014_v16 = vadd.f32 %v1013_v17, %v872_v5  ;;  %v753_v22 = vadd.f32 %v752_v41, %v2501_v56  ;;  %v642_v53 = vadd.f32 %v641_v42, %v2475_v31  ;;  %v1100_v32 = vrot.slane %v1099_v11, 2  ;;  %v645_v46 = vpop.f32.mrb[63].mxu0  ;;  %v758_v61 = vpop.f32.mrb[63].mxu1 }
 0x160   :  { %v877_v30 = vmax.f32 %v640_v9, 0.0  ;;  %v755_v20 = vadd.f32 %v754_v51, %v2514_v62  ;;  %v644_v21 = vadd.f32 %v643_v52, %v2466_v18  ;;  %v757_v58 = vadd.f32 %v756_v45, %v2501_v56 }
 0x161   :  { %v879_v50 = vmax.f32 %v753_v22, 0.0  ;;  %v878_v57 = vmax.f32 %v642_v53, 0.0  ;;  %v646_v7 = vadd.f32 %v645_v46, %v2475_v31  ;;  %v759_v40 = vadd.f32 %v758_v61, %v2514_v62 }
 0x162   :  { %v994_v28 = vadd.f32 %v993_v4, %v877_v30  ;;  %v880_v14 = vmax.f32 %v755_v20, 0.0  ;;  %v885_v23 = vmax.f32 %v644_v21, 0.0  ;;  %v887_v15 = vmax.f32 %v757_v58, 0.0 }
 0x163   :  { %v1008_v34 = vadd.f32 %v1007_v3, %v879_v50  ;;  %v1001_v47 = vadd.f32 %v1000_v55, %v878_v57  ;;  %v886_v43 = vmax.f32 %v646_v7, 0.0  ;;  %v1112_v0 = vrot.slane %v1111_v48, 2 }
 0x164   :  { %v1015_v18 = vadd.f32 %v1014_v16, %v880_v14  ;;  %v995_v1 = vadd.f32 %v994_v28, %v885_v23  ;;  %v888_v35 = vmax.f32 %v759_v40, 0.0  ;;  %v1095_v56 = vadd.f32 %v1094_v29, %v3017_v36  ;;  %v1708_v14 = vld [vmem:[%s3087_s4] ss:$0 sm:$0xff]  ;;  %s1989_s4 = scalar_lea.vmem %s1637_s17, 32 }
 0x165   :  { %v1009_v33 = vadd.f32 %v1008_v34, %v887_v15  ;;  %v1002_v25 = vadd.f32 %v1001_v47, %v886_v43  ;;  %v1107_v13 = vadd.f32 %v1106_v39, %v3020_v60  ;;  %v1101_v8 = vadd.f32 %v1100_v32, %v1099_v11  ;;  %p1990_p0 = scmp.ne.s32.totalorder %s1637_s17, %s1989_s4  ;;  %p1995_p2 = scmp.lt.s32.totalorder %s1989_s4, %s1989_s4 }
 0x166   :  { %v1140_v49 = vrot.slane %v995_v1, 4  ;;  %v1016_v31 = vadd.f32 %v1015_v18, %v888_v35  ;;  %v1113_v62 = vadd.f32 %v1112_v0, %v1111_v48  ;;  %v1096_v27 = vrot.slane %v1095_v56, 1 }
 0x167   :  { %v1152_v12 = vrot.slane %v1009_v33, 4  ;;  %v1146_v59 = vrot.slane %v1002_v25, 4  ;;  %v1108_v44 = vrot.slane %v1107_v13, 1  ;;  %v1102_v63 = vrot.slane %v1101_v8, 1  ;;  %p1996_p3 = por %p1995_p2, %p1994_p1 }
 0x168   :  { %v1141_v6 = vadd.f32 %v1140_v49, %v995_v1  ;;  %v1158_v10 = vrot.slane %v1016_v31, 4  ;;  %v1114_v4 = vrot.slane %v1113_v62, 1  ;;  %v1097_v55 = vadd.f32 %v1096_v27, %v1095_v56 }
 0x169   :  { %v1153_v19 = vadd.f32 %v1152_v12, %v1009_v33  ;;  %v1147_v54 = vadd.f32 %v1146_v59, %v1002_v25  ;;  %v1103_v29 = vadd.f32 %v1102_v63, %v1101_v8  ;;  %v1109_v9 = vadd.f32 %v1108_v44, %v1107_v13  ;;  %p1997_p4 = pnand %p1996_p3, %p1990_p0 }
 0x16a   :  { %v1142_v24 = vrot.slane %v1141_v6, 2  ;;  %v1159_v38 = vadd.f32 %v1158_v10, %v1016_v31  ;;  %v1115_v41 = vadd.f32 %v1114_v4, %v1113_v62  ;;  %v1168_v51 = vmul.f32 0.015625, %v1097_v55 }
 0x16b   :  { %v1154_v2 = vrot.slane %v1153_v19, 2  ;;  %v1148_v37 = vrot.slane %v1147_v54, 2  ;;  %v1169_v32 = vmul.f32 0.015625, %v1103_v29  ;;  %v1170_v20 = vmul.f32 0.015625, %v1109_v9 }
 0x16c   :  { %v1143_v36 = vadd.f32 %v1142_v24, %v1141_v6  ;;  %v1160_v17 = vrot.slane %v1159_v38, 2  ;;  %v1171_v45 = vmul.f32 0.015625, %v1115_v41 }
 0x16d   :  { %v1155_v5 = vadd.f32 %v1154_v2, %v1153_v19  ;;  %v1149_v60 = vadd.f32 %v1148_v37, %v1147_v54 }
 0x16e   :  { %v1144_v11 = vrot.slane %v1143_v36, 1  ;;  %v1161_v3 = vadd.f32 %v1160_v17, %v1159_v38 }
 0x16f   :  { %v1156_v26 = vrot.slane %v1155_v5, 1  ;;  %v1150_v16 = vrot.slane %v1149_v60, 1 }
 0x170   :  { %v1162_v42 = vrot.slane %v1161_v3, 1  ;;  %v1145_v39 = vadd.f32 %v1144_v11, %v1143_v36 }
 0x171   :  { %v1151_v48 = vadd.f32 %v1150_v16, %v1149_v60  ;;  %v1157_v22 = vadd.f32 %v1156_v26, %v1155_v5 }
 0x172   :  { %v1163_v53 = vadd.f32 %v1162_v42, %v1161_v3  ;;  %v1176_v52 = vmul.f32 0.015625, %v1145_v39 }
 0x173   :  { %v1177_v30 = vmul.f32 0.015625, %v1151_v48  ;;  %v1178_v21 = vmul.f32 0.015625, %v1157_v22 }
 0x174   :  { %v1179_v46 = vmul.f32 0.015625, %v1163_v53  ;;  %v1336_v50 = vsel %vm1331_vm1, %v1176_v52, %v1168_v51 }
 0x175   :  { %v1337_v57 = vsel %vm1331_vm1, %v1177_v30, %v1169_v32  ;;  %v1338_v58 = vsel %vm1331_vm1, %v1178_v21, %v1170_v20 }
 0x176   :  { %1552 = vmatprep.mubr.f32.mxu0 %v1337_v57  ;;  %v1339_v7 = vsel %vm1331_vm1, %v1179_v46, %v1171_v45 }
 0x177   :  { %1622 = vmatprep.mubr.f32.mxu1 %v1339_v7  ;;  %1553 = vmatmul.mubr.f32.vlgmr.msra.gmra.mrb[66].mxu0 %v1336_v50 }
 0x178   :  { %1623 = vmatmul.mubr.f32.vlgmr.msra.gmra.mrb[66].mxu1 %v1338_v58 }
 0x20f   :  { %v1741_v61 = vpop.f32.mrb[64].mxu0 }
 0x210   :  { %v1776_v28 = vpop.f32.mrb[64].mxu1  ;;  %v1742_v23 = vpop.f32.mrb[65].mxu0 }
 0x211   :  { %v1743_v40 = vadd.f32 %v1742_v23, %v1741_v61  ;;  %v1777_v34 = vpop.f32.mrb[65].mxu1 }
 0x212   :  { %v1778_v47 = vadd.f32 %v1777_v34, %v1776_v28 }
 0x213   :  { %v1415_v15 = vadd.f32 %v1743_v40, %v1708_v14 }
 0x215   :  { %v1485_v43 = vadd.f32 %v1778_v47, %v1415_v15 }
 0x24a   :  { %v1811_v0 = vpop.f32.mrb[66].mxu0 }
 0x24b   :  { %v1846_v18 = vpop.f32.mrb[66].mxu1  ;;  %v1812_v1 = vpop.f32.mrb[67].mxu0 }
 0x24c   :  { %v1813_v35 = vadd.f32 %v1812_v1, %v1811_v0  ;;  %v1847_v33 = vpop.f32.mrb[67].mxu1 }
 0x24d   :  { %v1848_v25 = vadd.f32 %v1847_v33, %v1846_v18 }
 0x24e   :  { %v1555_v56 = vadd.f32 %v1813_v35, %v1485_v43 }
 0x250   :  { %v1625_v49 = vadd.f32 %v1848_v25, %v1555_v56 }
 0x252   :  { %1987 = vtanh.f32 %v1625_v49 }
 0x25c   :  { %v1988_v31 = vpop.eup %1987 }
 0x25d   :  { %1629 = vst [vmem:[#allocation3] sm:$0x3] %v1988_v31 }
 0x25e   :  { %2000 = shalt.err (!%p1997_p4)
}
 0x25f   :  { %s2001_s1 = scalar_lea.hbm %s3088_s5, 32 }
 0x260   :  { %p2002_p5 = scmp.ne.s32.totalorder %s3088_s5, %s2001_s1  ;;  %p2005_p6 = scmp.lt.u32.totalorder %s2001_s1, %s3088_s5 }
 0x262   :  { %p2007_p7 = pnand %p2005_p6, %p2002_p5 }
 0x264   :  { %2010 = shalt.err (!%p2007_p7)
}
 0x265   :  { %1639 = dma.vmem_to_hbm [thread:$0]  %s1637_s17, 32, %s3088_s5, [#allocation4]  }
 0x266   :  { %2011 = dma.done.wait [#allocation4], 32  }
 0x267   :  { %2012 = vsyncadd [#allocation4], 4294967264 }
 0x268   :  { %1643 = vsyncpa [#allocation4], 1 }

</bundles_post_ra>
